<compile_context>
chip_gen: v7x
topology: tpu7x:2x2x1
jax: 0.10.0
libtpu: 0.0.40
codegen_flags: <defaults>
</compile_context>

<pallas_src>
import functools

import jax
import jax.numpy as jnp
from jax import lax
from jax.experimental import pallas as pl
from jax.experimental.pallas import tpu as pltpu


def _round_up(n, m):
    return ((n + m - 1) // m) * m


# ----------------------------------------------------------------------------- kernel
def _wordrnn_chunk_kernel(x_ref, h0_ref, c0_ref,
                          wx_ref, wh_ref, b_ref,
                          out_ref, h_out_ref, c_out_ref,
                          h_scr, c_scr, xproj_scr, *, seq_len, needs_mask):
    """One grid step = one chunk of Tc timesteps.

    x_ref:     (Tc*Bp, D)        chunk of inputs, bf16 (time-major, Bp rows per step)
    h0_ref:    (Bp, Hp)          initial hidden (f32, resident)
    c0_ref:    (Bp, Hp)          initial cell   (f32, resident)
    wx_ref:    (D,  4*Hp+Op)     [W_ih^T | W_o_x^T], per-gate padded, bf16, resident
    wh_ref:    (Hp, 4*Hp+Op)     [W_hh^T | W_o_h^T], per-gate padded, bf16, resident
    b_ref:     (1,  4*Hp+Op)     [b_ih+b_hh (pad=0) | b_o (pad=-1e30)], f32, resident
    out_ref:   (Tc*Bp, Op)       per-step log-probs (f32, lane-dense)
    h_out/c_out: (Bp, Hp)        final state (written only at the last chunk)
    h_scr/c_scr: (Bp, Hp)        carried state (VMEM scratch, persists across chunks)
    xproj_scr: (Tc*Bp, 4*Hp+Op)  hoisted x-side projections for the chunk (f32)
    """
    chunk = pl.program_id(0)
    Bp, Hp = h0_ref.shape
    Tc = x_ref.shape[0] // Bp
    w_dtype = wx_ref.dtype

    @pl.when(chunk == 0)
    def _init():
        h_scr[...] = h0_ref[...]
        c_scr[...] = c0_ref[...]

    # ---- Hoisted x-side projection: ONE tall matmul for the whole chunk (M = Tc*Bp).
    xproj_scr[...] = (
        jnp.dot(x_ref[...], wx_ref[...], preferred_element_type=jnp.float32)
        + b_ref[...])

    w_h = wh_ref[...]                       # resident bf16 (Hp, 4Hp+Op), hoisted load

    def sig(v):                             # sigmoid via one tanh pass (single EUP op)
        return 0.5 * (1.0 + jnp.tanh(0.5 * v))

    def step(t, h, c):
        row = t * Bp
        if not isinstance(row, int):        # dynamic (fori) path: hint alignment
            row = pl.multiple_of(row, Bp)

        # Fused h-side matmul: [gates_h | logits_h] in one MXU pass.
        hproj = jnp.dot(h.astype(w_dtype), w_h, preferred_element_type=jnp.float32)
        z = xproj_scr[pl.ds(row, Bp), :] + hproj          # (Bp, 4Hp+Op)

        # i2o(cat([x, h_prev])) -> log-softmax (uses the PREVIOUS hidden, as in torch).
        logits = z[:, 4 * Hp:]
        m = jnp.max(logits, axis=1, keepdims=True)
        shifted = logits - m
        lse = jnp.log(jnp.sum(jnp.exp(shifted), axis=1, keepdims=True))
        out_ref[pl.ds(row, Bp), :] = shifted - lse        # lane-dense, sublane-aligned

        # LSTMCell update (gate slices are 128-lane aligned).
        i_g = sig(z[:, 0 * Hp:1 * Hp])
        f_g = sig(z[:, 1 * Hp:2 * Hp])
        g_g = jnp.tanh(z[:, 2 * Hp:3 * Hp])
        o_g = sig(z[:, 3 * Hp:4 * Hp])
        c_new = f_g * c + i_g * g_g
        h_new = o_g * jnp.tanh(c_new)

        if needs_mask:                      # ragged last chunk: freeze state on pad steps
            valid = (chunk * Tc + t) < seq_len
            h_new = jnp.where(valid, h_new, h)
            c_new = jnp.where(valid, c_new, c)
        return h_new, c_new

    h = h_scr[...]
    c = c_scr[...]
    if Tc <= 16:
        # Fully unrolled: static slices/stores, full LLO scheduler visibility
        # (next step's MXU push overlaps this step's EUP/VPU tail).
        for t in range(Tc):
            h, c = step(t, h, c)
    else:
        h, c = lax.fori_loop(0, Tc, lambda t, hc: step(t, *hc), (h, c))

    h_scr[...] = h
    c_scr[...] = c

    @pl.when(chunk == pl.num_programs(0) - 1)
    def _finalize():
        h_out_ref[...] = h
        c_out_ref[...] = c


# ----------------------------------------------------------------------------- wrappers
def _resident(shape):
    """BlockSpec with a constant index_map: the array is DMA'd once and stays in VMEM."""
    return pl.BlockSpec(shape, lambda c: (0,) * len(shape))


def word_rnn_classify_sequence(x_seq, hidden, kparams, *, max_chunk=64):
    """Runs the module T times (hidden carried forward) in one fused pallas_call.

    x_seq: (T, B, D) f32;  hidden = (h0, c0) each (B, H) f32.
    Returns (out_seq (T, B, O), (h_T, c_T)).
    NOTE: padding + final slicing happen here for convenience; for repeated calls,
    pre-pad once outside and/or consume the padded layout (mask lanes >= O) to avoid
    the extra HBM passes.
    """
    h0, c0 = hidden
    T, B, D = x_seq.shape
    H = kparams["hidden_size"]
    O = kparams["output_size"]
    Hp = kparams["w_h_cat"].shape[0]
    Ntot = kparams["w_h_cat"].shape[1]
    Op = Ntot - 4 * Hp
    Bp = _round_up(max(B, 8), 8)

    Tc = T if T <= max_chunk else max_chunk          # chunk of timesteps per grid step
    num_chunks = pl.cdiv(T, Tc)
    Tp = num_chunks * Tc

    # Pad once. x is stored bf16 in HBM (the MXU consumes bf16 anyway) -> half the
    # streamed bytes. State stays f32.
    xp = jnp.zeros((Tp, Bp, D), jnp.bfloat16).at[:T, :B, :].set(
        x_seq.astype(jnp.bfloat16))
    xp2 = xp.reshape(Tp * Bp, D)                     # 2-D, time-major: no in-kernel reshape
    h0p = jnp.zeros((Bp, Hp), jnp.float32).at[:B, :H].set(h0.astype(jnp.float32))
    c0p = jnp.zeros((Bp, Hp), jnp.float32).at[:B, :H].set(c0.astype(jnp.float32))

    flops = 2 * Tp * Bp * (D + Hp) * Ntot
    transcendentals = Tp * Bp * (5 * Hp + Op)
    bytes_accessed = (2 * Tp * Bp * D + 4 * Tp * Bp * Op
                      + 2 * (D + Hp) * Ntot + 4 * Ntot + 4 * 6 * Bp * Hp)

    # Explicit VMEM budget from the actual footprint (double-buffered blocks + scratch),
    # with headroom; clamped so it is always a safe request.
    footprint = (2 * (2 * Tc * Bp * D + 4 * Tc * Bp * Op)
                 + 2 * (2 * (D + Hp) * Ntot + 4 * Ntot)
                 + 2 * 4 * 4 * Bp * Hp
                 + 4 * (2 * Bp * Hp + Tc * Bp * Ntot))
    vmem_limit = int(min(64 << 20, max(16 << 20, 2 * footprint)))

    out2, h_p, c_p = pl.pallas_call(
        functools.partial(_wordrnn_chunk_kernel, seq_len=T, needs_mask=(Tp != T)),
        grid=(num_chunks,),
        in_specs=[
            pl.BlockSpec((Tc * Bp, D), lambda c: (c, 0)),   # x: streamed per chunk
            _resident((Bp, Hp)), _resident((Bp, Hp)),       # h0, c0
            _resident((D, Ntot)), _resident((Hp, Ntot)),    # fused weights (bf16)
            _resident((1, Ntot)),                           # fused bias (f32)
        ],
        out_specs=[
            pl.BlockSpec((Tc * Bp, Op), lambda c: (c, 0)),  # log-probs per chunk
            _resident((Bp, Hp)), _resident((Bp, Hp)),       # final h, c
        ],
        out_shape=(
            jax.ShapeDtypeStruct((Tp * Bp, Op), jnp.float32),
            jax.ShapeDtypeStruct((Bp, Hp), jnp.float32),
            jax.ShapeDtypeStruct((Bp, Hp), jnp.float32),
        ),
        scratch_shapes=[
            pltpu.VMEM((Bp, Hp), jnp.float32),              # h carry
            pltpu.VMEM((Bp, Hp), jnp.float32),              # c carry
            pltpu.VMEM((Tc * Bp, Ntot), jnp.float32),       # hoisted x-projections
        ],
        compiler_params=pltpu.CompilerParams(
            dimension_semantics=("arbitrary",),             # recurrent axis => sequential
            vmem_limit_bytes=vmem_limit),
        cost_estimate=pl.CostEstimate(
            flops=int(flops),
            transcendentals=int(transcendentals),
            bytes_accessed=int(bytes_accessed)),
    )(xp2, h0p, c0p, kparams["w_x_cat"], kparams["w_h_cat"], kparams["b_cat"])

    out = out2.reshape(Tp, Bp, Op)[:T, :B, :O]
    return out, (h_p[:B, :H], c_p[:B, :H])


def word_rnn_classify_forward(x, hidden, kparams):
    """Single-step call matching the PyTorch module's forward signature."""
    out_seq, new_hidden = word_rnn_classify_sequence(x[None], hidden, kparams)
    return out_seq[0], new_hidden


# ----------------------------------------------------------------------------- params
def init_torch_params(key, input_size, hidden_size, output_size):
    """Synthetic parameters in PyTorch layout (for the reference)."""
    ks = jax.random.split(key, 6)
    s_lstm = 1.0 / jnp.sqrt(hidden_size)
    s_lin = 1.0 / jnp.sqrt(input_size + hidden_size)
    w_ih = jax.random.uniform(ks[0], (4 * hidden_size, input_size),
                              minval=-s_lstm, maxval=s_lstm, dtype=jnp.float32)
    w_hh = jax.random.uniform(ks[1], (4 * hidden_size, hidden_size),
                              minval=-s_lstm, maxval=s_lstm, dtype=jnp.float32)
    b_ih = jax.random.uniform(ks[2], (4 * hidden_size,),
                              minval=-s_lstm, maxval=s_lstm, dtype=jnp.float32)
    b_hh = jax.random.uniform(ks[3], (4 * hidden_size,),
                              minval=-s_lstm, maxval=s_lstm, dtype=jnp.float32)
    w_o = jax.random.uniform(ks[4], (output_size, input_size + hidden_size),
                             minval=-s_lin, maxval=s_lin, dtype=jnp.float32)
    b_o = jax.random.uniform(ks[5], (output_size,),
                             minval=-s_lin, maxval=s_lin, dtype=jnp.float32)
    return dict(w_ih=w_ih, w_hh=w_hh, b_ih=b_ih, b_hh=b_hh, w_o=w_o, b_o=b_o)


def build_kernel_params(tp, input_size, hidden_size, output_size,
                        weight_dtype=jnp.bfloat16):
    """Transpose + pad PyTorch params into the kernel's fused, lane-aligned layout.

    Columns of the fused weights: [i-gate | f-gate | g-gate | o-gate | output], each
    gate block Hp wide (pad bias 0), output block Op wide (pad bias -1e30).
    """
    D, H, O = input_size, hidden_size, output_size
    Hp = _round_up(H, 128)
    Op = _round_up(O, 128)
    Ntot = 4 * Hp + Op

    w_ih_t = tp["w_ih"].T                 # (D, 4H), gate blocks [i|f|g|o]
    w_hh_t = tp["w_hh"].T                 # (H, 4H)
    b_lstm = tp["b_ih"] + tp["b_hh"]

    w_x = jnp.zeros((D, Ntot), jnp.float32)
    w_h = jnp.zeros((Hp, Ntot), jnp.float32)
    b = jnp.zeros((1, Ntot), jnp.float32)
    for g in range(4):
        w_x = w_x.at[:, g * Hp:g * Hp + H].set(w_ih_t[:, g * H:(g + 1) * H])
        w_h = w_h.at[:H, g * Hp:g * Hp + H].set(w_hh_t[:, g * H:(g + 1) * H])
        b = b.at[0, g * Hp:g * Hp + H].set(b_lstm[g * H:(g + 1) * H])
    # Output block: split i2o columns into the x part and the h part of `combined`.
    w_x = w_x.at[:, 4 * Hp:4 * Hp + O].set(tp["w_o"][:, :D].T)
    w_h = w_h.at[:H, 4 * Hp:4 * Hp + O].set(tp["w_o"][:, D:].T)
    b = b.at[0, 4 * Hp + O:].set(-1e30)           # pad output cols ignored by softmax
    b = b.at[0, 4 * Hp:4 * Hp + O].set(tp["b_o"])

    return {
        "w_x_cat": w_x.astype(weight_dtype),      # (D, 4Hp+Op)  bf16
        "w_h_cat": w_h.astype(weight_dtype),      # (Hp, 4Hp+Op) bf16
        "b_cat": b,                               # (1, 4Hp+Op)  f32
        "hidden_size": H,
        "output_size": O,
    }


# ----------------------------------------------------------------------------- references
def _reference_sequence_f32(x_seq, h0, c0, tp):
    """Pure-f32 PyTorch-equivalent math (semantic reference)."""
    H = h0.shape[1]
    h, c = h0, c0
    outs = []
    for t in range(x_seq.shape[0]):
        x = x_seq[t]
        combined = jnp.concatenate([x, h], axis=1)
        logits = combined @ tp["w_o"].T + tp["b_o"]
        outs.append(jax.nn.log_softmax(logits, axis=1))
        gates = x @ tp["w_ih"].T + h @ tp["w_hh"].T + tp["b_ih"] + tp["b_hh"]
        i_g = jax.nn.sigmoid(gates[:, 0 * H:1 * H])
        f_g = jax.nn.sigmoid(gates[:, 1 * H:2 * H])
        g_g = jnp.tanh(gates[:, 2 * H:3 * H])
        o_g = jax.nn.sigmoid(gates[:, 3 * H:4 * H])
        c = f_g * c + i_g * g_g
        h = o_g * jnp.tanh(c)
    return jnp.stack(outs), (h, c)


def _reference_sequence_bf16(x_seq, h0, c0, tp):
    """Reference mirroring the kernel numerics (bf16 MXU inputs, f32 acc, tanh-sigmoid)."""
    H = h0.shape[1]
    D = x_seq.shape[-1]
    bf = lambda a: a.astype(jnp.bfloat16)
    sig = lambda v: 0.5 * (1.0 + jnp.tanh(0.5 * v))
    wih = bf(tp["w_ih"].T)
    whh = bf(tp["w_hh"].T)
    wox = bf(tp["w_o"][:, :D].T)
    woh = bf(tp["w_o"][:, D:].T)
    bl = tp["b_ih"] + tp["b_hh"]
    h, c = h0, c0
    outs = []
    for t in range(x_seq.shape[0]):
        x = bf(x_seq[t])
        logits = (jnp.dot(x, wox, preferred_element_type=jnp.float32) + tp["b_o"]
                  + jnp.dot(bf(h), woh, preferred_element_type=jnp.float32))
        outs.append(jax.nn.log_softmax(logits, axis=1))
        gates = (jnp.dot(x, wih, preferred_element_type=jnp.float32) + bl
                 + jnp.dot(bf(h), whh, preferred_element_type=jnp.float32))
        i_g = sig(gates[:, 0 * H:1 * H])
        f_g = sig(gates[:, 1 * H:2 * H])
        g_g = jnp.tanh(gates[:, 2 * H:3 * H])
        o_g = sig(gates[:, 3 * H:4 * H])
        c = f_g * c + i_g * g_g
        h = o_g * jnp.tanh(c)
    return jnp.stack(outs), (h, c)


# ----------------------------------------------------------------------------- main
if __name__ == "__main__":
    T, B, D, H, O = 8, 2, 32, 32, 16   # seq, batch, input_size, hidden_size, output_size

    key = jax.random.PRNGKey(0)
    k_x, k_h, k_c, k_p = jax.random.split(key, 4)
    x_seq = jax.random.normal(k_x, (T, B, D), dtype=jnp.float32)
    h0 = jax.random.normal(k_h, (B, H), dtype=jnp.float32)
    c0 = jax.random.normal(k_c, (B, H), dtype=jnp.float32)

    tp = init_torch_params(k_p, D, H, O)
    kp = build_kernel_params(tp, D, H, O)

    # Whole recurrence in one pallas_call (single chunk at this T).
    out, (h1, c1) = word_rnn_classify_sequence(x_seq, (h0, c0), kp)
    jax.block_until_ready((out, h1, c1))

    # Tight check vs a reference that matches the kernel's bf16-weight numerics.
    out_m, (h_m, c_m) = _reference_sequence_bf16(x_seq, h0, c0, tp)
    assert jnp.allclose(out, out_m, atol=2e-3), "log-softmax mismatch (bf16-matched ref)"
    assert jnp.allclose(h1, h_m, atol=2e-3), "h mismatch (bf16-matched ref)"
    assert jnp.allclose(c1, c_m, atol=2e-3), "c mismatch (bf16-matched ref)"

    # Looser semantic check vs pure-f32 PyTorch math (bf16 weight rounding compounds).
    out_f, (h_f, c_f) = _reference_sequence_f32(x_seq, h0, c0, tp)
    assert jnp.allclose(out, out_f, atol=5e-2), "log-softmax mismatch (f32 ref)"
    assert jnp.allclose(h1, h_f, atol=5e-2), "h mismatch (f32 ref)"
    assert jnp.allclose(c1, c_f, atol=5e-2), "c mismatch (f32 ref)"

    # Exercise the multi-chunk + ragged-last-chunk path (Tc=6 -> 2 chunks, 4 pad steps).
    out_c, (h_c, c_c) = word_rnn_classify_sequence(x_seq, (h0, c0), kp, max_chunk=6)
    jax.block_until_ready((out_c, h_c, c_c))
    assert jnp.allclose(out_c, out_m, atol=2e-3), "chunked output mismatch"
    assert jnp.allclose(h_c, h_m, atol=2e-3), "chunked h mismatch"
    assert jnp.allclose(c_c, c_m, atol=2e-3), "chunked c mismatch"

    # Single-step call matching the module's forward() signature.
    out1, (h_s, c_s) = word_rnn_classify_forward(x_seq[0], (h0, c0), kp)
    jax.block_until_ready((out1, h_s, c_s))
    assert jnp.allclose(out1, out_m[0], atol=2e-3), "single-step output mismatch"

    print("KERNEL_OK")
</pallas_src>

<mosaic_0001>
module attributes {stable_mosaic.version = 11 : i64} {
  func.func @_wordrnn_chunk_kernel(%arg0: i32, %arg1: memref<64x32xbf16, #tpu.memory_space<vmem>>, %arg2: memref<8x128xf32, #tpu.memory_space<vmem>>, %arg3: memref<8x128xf32, #tpu.memory_space<vmem>>, %arg4: memref<32x640xbf16, #tpu.memory_space<vmem>>, %arg5: memref<128x640xbf16, #tpu.memory_space<vmem>>, %arg6: memref<1x640xf32, #tpu.memory_space<vmem>>, %arg7: memref<64x128xf32, #tpu.memory_space<vmem>>, %arg8: memref<8x128xf32, #tpu.memory_space<vmem>>, %arg9: memref<8x128xf32, #tpu.memory_space<vmem>>, %arg10: memref<8x128xf32, #tpu.memory_space<vmem>>, %arg11: memref<8x128xf32, #tpu.memory_space<vmem>>, %arg12: memref<64x640xf32, #tpu.memory_space<vmem>>) attributes {dimension_semantics = [#tpu.dimension_semantics<arbitrary>], iteration_bounds = array<i64: 1>, scalar_prefetch = 0 : i64, scratch_operands = 3 : i64, tpu.core_type = #tpu.core_type<tc>, window_params = [{transform_indices = @transform_0, window_bounds = array<i64: 64, 32>}, {pipeline_mode = #tpu.pipeline_mode<synchronous>, transform_indices = @transform_1, window_bounds = array<i64: 8, 128>}, {pipeline_mode = #tpu.pipeline_mode<synchronous>, transform_indices = @transform_2, window_bounds = array<i64: 8, 128>}, {pipeline_mode = #tpu.pipeline_mode<synchronous>, transform_indices = @transform_3, window_bounds = array<i64: 32, 640>}, {pipeline_mode = #tpu.pipeline_mode<synchronous>, transform_indices = @transform_4, window_bounds = array<i64: 128, 640>}, {pipeline_mode = #tpu.pipeline_mode<synchronous>, transform_indices = @transform_5, window_bounds = array<i64: 1, 640>}, {transform_indices = @transform_6, window_bounds = array<i64: 64, 128>}, {pipeline_mode = #tpu.pipeline_mode<synchronous>, transform_indices = @transform_7, window_bounds = array<i64: 8, 128>}, {pipeline_mode = #tpu.pipeline_mode<synchronous>, transform_indices = @transform_8, window_bounds = array<i64: 8, 128>}]} {
    %c0_i32 = arith.constant 0 : i32
    %0 = arith.cmpi eq, %arg0, %c0_i32 : i32
    %1 = arith.extui %0 : i1 to i32
    %c0_i32_0 = arith.constant 0 : i32
    %2 = arith.cmpi ne, %1, %c0_i32_0 : i32
    scf.if %2 {
      %c0_141 = arith.constant 0 : index
      %c0_142 = arith.constant 0 : index
      %394 = vector.load %arg2[%c0_141, %c0_142] : memref<8x128xf32, #tpu.memory_space<vmem>>, vector<8x128xf32>
      %c0_143 = arith.constant 0 : index
      %c0_144 = arith.constant 0 : index
      %395 = vector.load %arg10[%c0_143, %c0_144] : memref<8x128xf32, #tpu.memory_space<vmem>>, vector<8x128xf32>
      tpu.vector_store %arg10[%c0_143, %c0_144], %394 {strides = array<i32>} : memref<8x128xf32, #tpu.memory_space<vmem>>, vector<8x128xf32>,
      %c0_145 = arith.constant 0 : index
      %c0_146 = arith.constant 0 : index
      %396 = vector.load %arg3[%c0_145, %c0_146] : memref<8x128xf32, #tpu.memory_space<vmem>>, vector<8x128xf32>
      %c0_147 = arith.constant 0 : index
      %c0_148 = arith.constant 0 : index
      %397 = vector.load %arg11[%c0_147, %c0_148] : memref<8x128xf32, #tpu.memory_space<vmem>>, vector<8x128xf32>
      tpu.vector_store %arg11[%c0_147, %c0_148], %396 {strides = array<i32>} : memref<8x128xf32, #tpu.memory_space<vmem>>, vector<8x128xf32>,
    } else {
    }
    %c0 = arith.constant 0 : index
    %c0_1 = arith.constant 0 : index
    %3 = vector.load %arg1[%c0, %c0_1] : memref<64x32xbf16, #tpu.memory_space<vmem>>, vector<64x32xbf16>
    %c0_2 = arith.constant 0 : index
    %c0_3 = arith.constant 0 : index
    %4 = vector.load %arg4[%c0_2, %c0_3] : memref<32x640xbf16, #tpu.memory_space<vmem>>, vector<32x640xbf16>
    %cst = arith.constant dense<0.000000e+00> : vector<64x640xf32>
    %5 = tpu.matmul %3, %4, %cst {dimension_numbers = #tpu.dot_dimension_numbers<[1], [0], [0], [1], [0, 0, 1, 1], [], []>} : vector<64x32xbf16>, vector<32x640xbf16>, vector<64x640xf32> -> vector<64x640xf32>
    %c0_4 = arith.constant 0 : index
    %c0_5 = arith.constant 0 : index
    %6 = vector.load %arg6[%c0_4, %c0_5] : memref<1x640xf32, #tpu.memory_space<vmem>>, vector<1x640xf32>
    %7 = vector.broadcast %6 : vector<1x640xf32> to vector<64x640xf32>
    %8 = arith.addf %5, %7 : vector<64x640xf32>
    %c0_6 = arith.constant 0 : index
    %c0_7 = arith.constant 0 : index
    %9 = vector.load %arg12[%c0_6, %c0_7] : memref<64x640xf32, #tpu.memory_space<vmem>>, vector<64x640xf32>
    tpu.vector_store %arg12[%c0_6, %c0_7], %8 {strides = array<i32>} : memref<64x640xf32, #tpu.memory_space<vmem>>, vector<64x640xf32>,
    %c0_8 = arith.constant 0 : index
    %c0_9 = arith.constant 0 : index
    %10 = vector.load %arg5[%c0_8, %c0_9] : memref<128x640xbf16, #tpu.memory_space<vmem>>, vector<128x640xbf16>
    %c0_10 = arith.constant 0 : index
    %c0_11 = arith.constant 0 : index
    %11 = vector.load %arg10[%c0_10, %c0_11] : memref<8x128xf32, #tpu.memory_space<vmem>>, vector<8x128xf32>
    %c0_12 = arith.constant 0 : index
    %c0_13 = arith.constant 0 : index
    %12 = vector.load %arg11[%c0_12, %c0_13] : memref<8x128xf32, #tpu.memory_space<vmem>>, vector<8x128xf32>
    %13 = arith.truncf %11 : vector<8x128xf32> to vector<8x128xbf16>
    %cst_14 = arith.constant dense<0.000000e+00> : vector<8x640xf32>
    %14 = tpu.matmul %13, %10, %cst_14 {dimension_numbers = #tpu.dot_dimension_numbers<[1], [0], [0], [1], [0, 0, 1, 1], [], []>} : vector<8x128xbf16>, vector<128x640xbf16>, vector<8x640xf32> -> vector<8x640xf32>
    %c0_15 = arith.constant 0 : index
    %c0_16 = arith.constant 0 : index
    %15 = vector.load %arg12[%c0_15, %c0_16] : memref<64x640xf32, #tpu.memory_space<vmem>>, vector<8x640xf32>
    %16 = arith.addf %15, %14 : vector<8x640xf32>
    %17 = vector.extract_strided_slice %16 {offsets = [0, 512], sizes = [8, 128], strides = [1, 1]} : vector<8x640xf32> to vector<8x128xf32>
    %cst_17 = arith.constant dense<0xFF800000> : vector<8xf32>
    %18 = vector.multi_reduction <maximumf>, %17, %cst_17 [1] : vector<8x128xf32> to vector<8xf32>
    %19 = vector.shape_cast %18 : vector<8xf32> to vector<8x1xf32>
    %20 = vector.broadcast %19 : vector<8x1xf32> to vector<8x128xf32>
    %21 = arith.subf %17, %20 : vector<8x128xf32>
    %22 = math.exp %21 : vector<8x128xf32>
    %cst_18 = arith.constant dense<0.000000e+00> : vector<8xf32>
    %23 = vector.multi_reduction <add>, %22, %cst_18 [1] : vector<8x128xf32> to vector<8xf32>
    %24 = vector.shape_cast %23 : vector<8xf32> to vector<8x1xf32>
    %25 = math.log %24 : vector<8x1xf32>
    %26 = vector.broadcast %25 : vector<8x1xf32> to vector<8x128xf32>
    %27 = arith.subf %21, %26 : vector<8x128xf32>
    %c0_19 = arith.constant 0 : index
    %c0_20 = arith.constant 0 : index
    %28 = vector.load %arg7[%c0_19, %c0_20] : memref<64x128xf32, #tpu.memory_space<vmem>>, vector<8x128xf32>
    tpu.vector_store %arg7[%c0_19, %c0_20], %27 {strides = array<i32>} : memref<64x128xf32, #tpu.memory_space<vmem>>, vector<8x128xf32>,
    %29 = vector.extract_strided_slice %16 {offsets = [0, 0], sizes = [8, 128], strides = [1, 1]} : vector<8x640xf32> to vector<8x128xf32>
    %cst_21 = arith.constant 5.000000e-01 : f32
    %30 = vector.broadcast %cst_21 : f32 to vector<8x128xf32>
    %31 = arith.mulf %30, %29 : vector<8x128xf32>
    %32 = math.tanh %31 : vector<8x128xf32>
    %cst_22 = arith.constant 1.000000e+00 : f32
    %33 = vector.broadcast %cst_22 : f32 to vector<8x128xf32>
    %34 = arith.addf %33, %32 : vector<8x128xf32>
    %cst_23 = arith.constant 5.000000e-01 : f32
    %35 = vector.broadcast %cst_23 : f32 to vector<8x128xf32>
    %36 = arith.mulf %35, %34 : vector<8x128xf32>
    %37 = vector.extract_strided_slice %16 {offsets = [0, 128], sizes = [8, 128], strides = [1, 1]} : vector<8x640xf32> to vector<8x128xf32>
    %cst_24 = arith.constant 5.000000e-01 : f32
    %38 = vector.broadcast %cst_24 : f32 to vector<8x128xf32>
    %39 = arith.mulf %38, %37 : vector<8x128xf32>
    %40 = math.tanh %39 : vector<8x128xf32>
    %cst_25 = arith.constant 1.000000e+00 : f32
    %41 = vector.broadcast %cst_25 : f32 to vector<8x128xf32>
    %42 = arith.addf %41, %40 : vector<8x128xf32>
    %cst_26 = arith.constant 5.000000e-01 : f32
    %43 = vector.broadcast %cst_26 : f32 to vector<8x128xf32>
    %44 = arith.mulf %43, %42 : vector<8x128xf32>
    %45 = vector.extract_strided_slice %16 {offsets = [0, 256], sizes = [8, 128], strides = [1, 1]} : vector<8x640xf32> to vector<8x128xf32>
    %46 = math.tanh %45 : vector<8x128xf32>
    %47 = vector.extract_strided_slice %16 {offsets = [0, 384], sizes = [8, 128], strides = [1, 1]} : vector<8x640xf32> to vector<8x128xf32>
    %cst_27 = arith.constant 5.000000e-01 : f32
    %48 = vector.broadcast %cst_27 : f32 to vector<8x128xf32>
    %49 = arith.mulf %48, %47 : vector<8x128xf32>
    %50 = math.tanh %49 : vector<8x128xf32>
    %cst_28 = arith.constant 1.000000e+00 : f32
    %51 = vector.broadcast %cst_28 : f32 to vector<8x128xf32>
    %52 = arith.addf %51, %50 : vector<8x128xf32>
    %cst_29 = arith.constant 5.000000e-01 : f32
    %53 = vector.broadcast %cst_29 : f32 to vector<8x128xf32>
    %54 = arith.mulf %53, %52 : vector<8x128xf32>
    %55 = arith.mulf %44, %12 : vector<8x128xf32>
    %56 = arith.mulf %36, %46 : vector<8x128xf32>
    %57 = arith.addf %55, %56 : vector<8x128xf32>
    %58 = math.tanh %57 : vector<8x128xf32>
    %59 = arith.mulf %54, %58 : vector<8x128xf32>
    %60 = arith.truncf %59 : vector<8x128xf32> to vector<8x128xbf16>
    %cst_30 = arith.constant dense<0.000000e+00> : vector<8x640xf32>
    %61 = tpu.matmul %60, %10, %cst_30 {dimension_numbers = #tpu.dot_dimension_numbers<[1], [0], [0], [1], [0, 0, 1, 1], [], []>} : vector<8x128xbf16>, vector<128x640xbf16>, vector<8x640xf32> -> vector<8x640xf32>
    %c8 = arith.constant 8 : index
    %c0_31 = arith.constant 0 : index
    %62 = vector.load %arg12[%c8, %c0_31] : memref<64x640xf32, #tpu.memory_space<vmem>>, vector<8x640xf32>
    %63 = arith.addf %62, %61 : vector<8x640xf32>
    %64 = vector.extract_strided_slice %63 {offsets = [0, 512], sizes = [8, 128], strides = [1, 1]} : vector<8x640xf32> to vector<8x128xf32>
    %cst_32 = arith.constant dense<0xFF800000> : vector<8xf32>
    %65 = vector.multi_reduction <maximumf>, %64, %cst_32 [1] : vector<8x128xf32> to vector<8xf32>
    %66 = vector.shape_cast %65 : vector<8xf32> to vector<8x1xf32>
    %67 = vector.broadcast %66 : vector<8x1xf32> to vector<8x128xf32>
    %68 = arith.subf %64, %67 : vector<8x128xf32>
    %69 = math.exp %68 : vector<8x128xf32>
    %cst_33 = arith.constant dense<0.000000e+00> : vector<8xf32>
    %70 = vector.multi_reduction <add>, %69, %cst_33 [1] : vector<8x128xf32> to vector<8xf32>
    %71 = vector.shape_cast %70 : vector<8xf32> to vector<8x1xf32>
    %72 = math.log %71 : vector<8x1xf32>
    %73 = vector.broadcast %72 : vector<8x1xf32> to vector<8x128xf32>
    %74 = arith.subf %68, %73 : vector<8x128xf32>
    %c8_34 = arith.constant 8 : index
    %c0_35 = arith.constant 0 : index
    %75 = vector.load %arg7[%c8_34, %c0_35] : memref<64x128xf32, #tpu.memory_space<vmem>>, vector<8x128xf32>
    tpu.vector_store %arg7[%c8_34, %c0_35], %74 {strides = array<i32>} : memref<64x128xf32, #tpu.memory_space<vmem>>, vector<8x128xf32>,
    %76 = vector.extract_strided_slice %63 {offsets = [0, 0], sizes = [8, 128], strides = [1, 1]} : vector<8x640xf32> to vector<8x128xf32>
    %cst_36 = arith.constant 5.000000e-01 : f32
    %77 = vector.broadcast %cst_36 : f32 to vector<8x128xf32>
    %78 = arith.mulf %77, %76 : vector<8x128xf32>
    %79 = math.tanh %78 : vector<8x128xf32>
    %cst_37 = arith.constant 1.000000e+00 : f32
    %80 = vector.broadcast %cst_37 : f32 to vector<8x128xf32>
    %81 = arith.addf %80, %79 : vector<8x128xf32>
    %cst_38 = arith.constant 5.000000e-01 : f32
    %82 = vector.broadcast %cst_38 : f32 to vector<8x128xf32>
    %83 = arith.mulf %82, %81 : vector<8x128xf32>
    %84 = vector.extract_strided_slice %63 {offsets = [0, 128], sizes = [8, 128], strides = [1, 1]} : vector<8x640xf32> to vector<8x128xf32>
    %cst_39 = arith.constant 5.000000e-01 : f32
    %85 = vector.broadcast %cst_39 : f32 to vector<8x128xf32>
    %86 = arith.mulf %85, %84 : vector<8x128xf32>
    %87 = math.tanh %86 : vector<8x128xf32>
    %cst_40 = arith.constant 1.000000e+00 : f32
    %88 = vector.broadcast %cst_40 : f32 to vector<8x128xf32>
    %89 = arith.addf %88, %87 : vector<8x128xf32>
    %cst_41 = arith.constant 5.000000e-01 : f32
    %90 = vector.broadcast %cst_41 : f32 to vector<8x128xf32>
    %91 = arith.mulf %90, %89 : vector<8x128xf32>
    %92 = vector.extract_strided_slice %63 {offsets = [0, 256], sizes = [8, 128], strides = [1, 1]} : vector<8x640xf32> to vector<8x128xf32>
    %93 = math.tanh %92 : vector<8x128xf32>
    %94 = vector.extract_strided_slice %63 {offsets = [0, 384], sizes = [8, 128], strides = [1, 1]} : vector<8x640xf32> to vector<8x128xf32>
    %cst_42 = arith.constant 5.000000e-01 : f32
    %95 = vector.broadcast %cst_42 : f32 to vector<8x128xf32>
    %96 = arith.mulf %95, %94 : vector<8x128xf32>
    %97 = math.tanh %96 : vector<8x128xf32>
    %cst_43 = arith.constant 1.000000e+00 : f32
    %98 = vector.broadcast %cst_43 : f32 to vector<8x128xf32>
    %99 = arith.addf %98, %97 : vector<8x128xf32>
    %cst_44 = arith.constant 5.000000e-01 : f32
    %100 = vector.broadcast %cst_44 : f32 to vector<8x128xf32>
    %101 = arith.mulf %100, %99 : vector<8x128xf32>
    %102 = arith.mulf %91, %57 : vector<8x128xf32>
    %103 = arith.mulf %83, %93 : vector<8x128xf32>
    %104 = arith.addf %102, %103 : vector<8x128xf32>
    %105 = math.tanh %104 : vector<8x128xf32>
    %106 = arith.mulf %101, %105 : vector<8x128xf32>
    %107 = arith.truncf %106 : vector<8x128xf32> to vector<8x128xbf16>
    %cst_45 = arith.constant dense<0.000000e+00> : vector<8x640xf32>
    %108 = tpu.matmul %107, %10, %cst_45 {dimension_numbers = #tpu.dot_dimension_numbers<[1], [0], [0], [1], [0, 0, 1, 1], [], []>} : vector<8x128xbf16>, vector<128x640xbf16>, vector<8x640xf32> -> vector<8x640xf32>
    %c16 = arith.constant 16 : index
    %c0_46 = arith.constant 0 : index
    %109 = vector.load %arg12[%c16, %c0_46] : memref<64x640xf32, #tpu.memory_space<vmem>>, vector<8x640xf32>
    %110 = arith.addf %109, %108 : vector<8x640xf32>
    %111 = vector.extract_strided_slice %110 {offsets = [0, 512], sizes = [8, 128], strides = [1, 1]} : vector<8x640xf32> to vector<8x128xf32>
    %cst_47 = arith.constant dense<0xFF800000> : vector<8xf32>
    %112 = vector.multi_reduction <maximumf>, %111, %cst_47 [1] : vector<8x128xf32> to vector<8xf32>
    %113 = vector.shape_cast %112 : vector<8xf32> to vector<8x1xf32>
    %114 = vector.broadcast %113 : vector<8x1xf32> to vector<8x128xf32>
    %115 = arith.subf %111, %114 : vector<8x128xf32>
    %116 = math.exp %115 : vector<8x128xf32>
    %cst_48 = arith.constant dense<0.000000e+00> : vector<8xf32>
    %117 = vector.multi_reduction <add>, %116, %cst_48 [1] : vector<8x128xf32> to vector<8xf32>
    %118 = vector.shape_cast %117 : vector<8xf32> to vector<8x1xf32>
    %119 = math.log %118 : vector<8x1xf32>
    %120 = vector.broadcast %119 : vector<8x1xf32> to vector<8x128xf32>
    %121 = arith.subf %115, %120 : vector<8x128xf32>
    %c16_49 = arith.constant 16 : index
    %c0_50 = arith.constant 0 : index
    %122 = vector.load %arg7[%c16_49, %c0_50] : memref<64x128xf32, #tpu.memory_space<vmem>>, vector<8x128xf32>
    tpu.vector_store %arg7[%c16_49, %c0_50], %121 {strides = array<i32>} : memref<64x128xf32, #tpu.memory_space<vmem>>, vector<8x128xf32>,
    %123 = vector.extract_strided_slice %110 {offsets = [0, 0], sizes = [8, 128], strides = [1, 1]} : vector<8x640xf32> to vector<8x128xf32>
    %cst_51 = arith.constant 5.000000e-01 : f32
    %124 = vector.broadcast %cst_51 : f32 to vector<8x128xf32>
    %125 = arith.mulf %124, %123 : vector<8x128xf32>
    %126 = math.tanh %125 : vector<8x128xf32>
    %cst_52 = arith.constant 1.000000e+00 : f32
    %127 = vector.broadcast %cst_52 : f32 to vector<8x128xf32>
    %128 = arith.addf %127, %126 : vector<8x128xf32>
    %cst_53 = arith.constant 5.000000e-01 : f32
    %129 = vector.broadcast %cst_53 : f32 to vector<8x128xf32>
    %130 = arith.mulf %129, %128 : vector<8x128xf32>
    %131 = vector.extract_strided_slice %110 {offsets = [0, 128], sizes = [8, 128], strides = [1, 1]} : vector<8x640xf32> to vector<8x128xf32>
    %cst_54 = arith.constant 5.000000e-01 : f32
    %132 = vector.broadcast %cst_54 : f32 to vector<8x128xf32>
    %133 = arith.mulf %132, %131 : vector<8x128xf32>
    %134 = math.tanh %133 : vector<8x128xf32>
    %cst_55 = arith.constant 1.000000e+00 : f32
    %135 = vector.broadcast %cst_55 : f32 to vector<8x128xf32>
    %136 = arith.addf %135, %134 : vector<8x128xf32>
    %cst_56 = arith.constant 5.000000e-01 : f32
    %137 = vector.broadcast %cst_56 : f32 to vector<8x128xf32>
    %138 = arith.mulf %137, %136 : vector<8x128xf32>
    %139 = vector.extract_strided_slice %110 {offsets = [0, 256], sizes = [8, 128], strides = [1, 1]} : vector<8x640xf32> to vector<8x128xf32>
    %140 = math.tanh %139 : vector<8x128xf32>
    %141 = vector.extract_strided_slice %110 {offsets = [0, 384], sizes = [8, 128], strides = [1, 1]} : vector<8x640xf32> to vector<8x128xf32>
    %cst_57 = arith.constant 5.000000e-01 : f32
    %142 = vector.broadcast %cst_57 : f32 to vector<8x128xf32>
    %143 = arith.mulf %142, %141 : vector<8x128xf32>
    %144 = math.tanh %143 : vector<8x128xf32>
    %cst_58 = arith.constant 1.000000e+00 : f32
    %145 = vector.broadcast %cst_58 : f32 to vector<8x128xf32>
    %146 = arith.addf %145, %144 : vector<8x128xf32>
    %cst_59 = arith.constant 5.000000e-01 : f32
    %147 = vector.broadcast %cst_59 : f32 to vector<8x128xf32>
    %148 = arith.mulf %147, %146 : vector<8x128xf32>
    %149 = arith.mulf %138, %104 : vector<8x128xf32>
    %150 = arith.mulf %130, %140 : vector<8x128xf32>
    %151 = arith.addf %149, %150 : vector<8x128xf32>
    %152 = math.tanh %151 : vector<8x128xf32>
    %153 = arith.mulf %148, %152 : vector<8x128xf32>
    %154 = arith.truncf %153 : vector<8x128xf32> to vector<8x128xbf16>
    %cst_60 = arith.constant dense<0.000000e+00> : vector<8x640xf32>
    %155 = tpu.matmul %154, %10, %cst_60 {dimension_numbers = #tpu.dot_dimension_numbers<[1], [0], [0], [1], [0, 0, 1, 1], [], []>} : vector<8x128xbf16>, vector<128x640xbf16>, vector<8x640xf32> -> vector<8x640xf32>
    %c24 = arith.constant 24 : index
    %c0_61 = arith.constant 0 : index
    %156 = vector.load %arg12[%c24, %c0_61] : memref<64x640xf32, #tpu.memory_space<vmem>>, vector<8x640xf32>
    %157 = arith.addf %156, %155 : vector<8x640xf32>
    %158 = vector.extract_strided_slice %157 {offsets = [0, 512], sizes = [8, 128], strides = [1, 1]} : vector<8x640xf32> to vector<8x128xf32>
    %cst_62 = arith.constant dense<0xFF800000> : vector<8xf32>
    %159 = vector.multi_reduction <maximumf>, %158, %cst_62 [1] : vector<8x128xf32> to vector<8xf32>
    %160 = vector.shape_cast %159 : vector<8xf32> to vector<8x1xf32>
    %161 = vector.broadcast %160 : vector<8x1xf32> to vector<8x128xf32>
    %162 = arith.subf %158, %161 : vector<8x128xf32>
    %163 = math.exp %162 : vector<8x128xf32>
    %cst_63 = arith.constant dense<0.000000e+00> : vector<8xf32>
    %164 = vector.multi_reduction <add>, %163, %cst_63 [1] : vector<8x128xf32> to vector<8xf32>
    %165 = vector.shape_cast %164 : vector<8xf32> to vector<8x1xf32>
    %166 = math.log %165 : vector<8x1xf32>
    %167 = vector.broadcast %166 : vector<8x1xf32> to vector<8x128xf32>
    %168 = arith.subf %162, %167 : vector<8x128xf32>
    %c24_64 = arith.constant 24 : index
    %c0_65 = arith.constant 0 : index
    %169 = vector.load %arg7[%c24_64, %c0_65] : memref<64x128xf32, #tpu.memory_space<vmem>>, vector<8x128xf32>
    tpu.vector_store %arg7[%c24_64, %c0_65], %168 {strides = array<i32>} : memref<64x128xf32, #tpu.memory_space<vmem>>, vector<8x128xf32>,
    %170 = vector.extract_strided_slice %157 {offsets = [0, 0], sizes = [8, 128], strides = [1, 1]} : vector<8x640xf32> to vector<8x128xf32>
    %cst_66 = arith.constant 5.000000e-01 : f32
    %171 = vector.broadcast %cst_66 : f32 to vector<8x128xf32>
    %172 = arith.mulf %171, %170 : vector<8x128xf32>
    %173 = math.tanh %172 : vector<8x128xf32>
    %cst_67 = arith.constant 1.000000e+00 : f32
    %174 = vector.broadcast %cst_67 : f32 to vector<8x128xf32>
    %175 = arith.addf %174, %173 : vector<8x128xf32>
    %cst_68 = arith.constant 5.000000e-01 : f32
    %176 = vector.broadcast %cst_68 : f32 to vector<8x128xf32>
    %177 = arith.mulf %176, %175 : vector<8x128xf32>
    %178 = vector.extract_strided_slice %157 {offsets = [0, 128], sizes = [8, 128], strides = [1, 1]} : vector<8x640xf32> to vector<8x128xf32>
    %cst_69 = arith.constant 5.000000e-01 : f32
    %179 = vector.broadcast %cst_69 : f32 to vector<8x128xf32>
    %180 = arith.mulf %179, %178 : vector<8x128xf32>
    %181 = math.tanh %180 : vector<8x128xf32>
    %cst_70 = arith.constant 1.000000e+00 : f32
    %182 = vector.broadcast %cst_70 : f32 to vector<8x128xf32>
    %183 = arith.addf %182, %181 : vector<8x128xf32>
    %cst_71 = arith.constant 5.000000e-01 : f32
    %184 = vector.broadcast %cst_71 : f32 to vector<8x128xf32>
    %185 = arith.mulf %184, %183 : vector<8x128xf32>
    %186 = vector.extract_strided_slice %157 {offsets = [0, 256], sizes = [8, 128], strides = [1, 1]} : vector<8x640xf32> to vector<8x128xf32>
    %187 = math.tanh %186 : vector<8x128xf32>
    %188 = vector.extract_strided_slice %157 {offsets = [0, 384], sizes = [8, 128], strides = [1, 1]} : vector<8x640xf32> to vector<8x128xf32>
    %cst_72 = arith.constant 5.000000e-01 : f32
    %189 = vector.broadcast %cst_72 : f32 to vector<8x128xf32>
    %190 = arith.mulf %189, %188 : vector<8x128xf32>
    %191 = math.tanh %190 : vector<8x128xf32>
    %cst_73 = arith.constant 1.000000e+00 : f32
    %192 = vector.broadcast %cst_73 : f32 to vector<8x128xf32>
    %193 = arith.addf %192, %191 : vector<8x128xf32>
    %cst_74 = arith.constant 5.000000e-01 : f32
    %194 = vector.broadcast %cst_74 : f32 to vector<8x128xf32>
    %195 = arith.mulf %194, %193 : vector<8x128xf32>
    %196 = arith.mulf %185, %151 : vector<8x128xf32>
    %197 = arith.mulf %177, %187 : vector<8x128xf32>
    %198 = arith.addf %196, %197 : vector<8x128xf32>
    %199 = math.tanh %198 : vector<8x128xf32>
    %200 = arith.mulf %195, %199 : vector<8x128xf32>
    %201 = arith.truncf %200 : vector<8x128xf32> to vector<8x128xbf16>
    %cst_75 = arith.constant dense<0.000000e+00> : vector<8x640xf32>
    %202 = tpu.matmul %201, %10, %cst_75 {dimension_numbers = #tpu.dot_dimension_numbers<[1], [0], [0], [1], [0, 0, 1, 1], [], []>} : vector<8x128xbf16>, vector<128x640xbf16>, vector<8x640xf32> -> vector<8x640xf32>
    %c32 = arith.constant 32 : index
    %c0_76 = arith.constant 0 : index
    %203 = vector.load %arg12[%c32, %c0_76] : memref<64x640xf32, #tpu.memory_space<vmem>>, vector<8x640xf32>
    %204 = arith.addf %203, %202 : vector<8x640xf32>
    %205 = vector.extract_strided_slice %204 {offsets = [0, 512], sizes = [8, 128], strides = [1, 1]} : vector<8x640xf32> to vector<8x128xf32>
    %cst_77 = arith.constant dense<0xFF800000> : vector<8xf32>
    %206 = vector.multi_reduction <maximumf>, %205, %cst_77 [1] : vector<8x128xf32> to vector<8xf32>
    %207 = vector.shape_cast %206 : vector<8xf32> to vector<8x1xf32>
    %208 = vector.broadcast %207 : vector<8x1xf32> to vector<8x128xf32>
    %209 = arith.subf %205, %208 : vector<8x128xf32>
    %210 = math.exp %209 : vector<8x128xf32>
    %cst_78 = arith.constant dense<0.000000e+00> : vector<8xf32>
    %211 = vector.multi_reduction <add>, %210, %cst_78 [1] : vector<8x128xf32> to vector<8xf32>
    %212 = vector.shape_cast %211 : vector<8xf32> to vector<8x1xf32>
    %213 = math.log %212 : vector<8x1xf32>
    %214 = vector.broadcast %213 : vector<8x1xf32> to vector<8x128xf32>
    %215 = arith.subf %209, %214 : vector<8x128xf32>
    %c32_79 = arith.constant 32 : index
    %c0_80 = arith.constant 0 : index
    %216 = vector.load %arg7[%c32_79, %c0_80] : memref<64x128xf32, #tpu.memory_space<vmem>>, vector<8x128xf32>
    tpu.vector_store %arg7[%c32_79, %c0_80], %215 {strides = array<i32>} : memref<64x128xf32, #tpu.memory_space<vmem>>, vector<8x128xf32>,
    %217 = vector.extract_strided_slice %204 {offsets = [0, 0], sizes = [8, 128], strides = [1, 1]} : vector<8x640xf32> to vector<8x128xf32>
    %cst_81 = arith.constant 5.000000e-01 : f32
    %218 = vector.broadcast %cst_81 : f32 to vector<8x128xf32>
    %219 = arith.mulf %218, %217 : vector<8x128xf32>
    %220 = math.tanh %219 : vector<8x128xf32>
    %cst_82 = arith.constant 1.000000e+00 : f32
    %221 = vector.broadcast %cst_82 : f32 to vector<8x128xf32>
    %222 = arith.addf %221, %220 : vector<8x128xf32>
    %cst_83 = arith.constant 5.000000e-01 : f32
    %223 = vector.broadcast %cst_83 : f32 to vector<8x128xf32>
    %224 = arith.mulf %223, %222 : vector<8x128xf32>
    %225 = vector.extract_strided_slice %204 {offsets = [0, 128], sizes = [8, 128], strides = [1, 1]} : vector<8x640xf32> to vector<8x128xf32>
    %cst_84 = arith.constant 5.000000e-01 : f32
    %226 = vector.broadcast %cst_84 : f32 to vector<8x128xf32>
    %227 = arith.mulf %226, %225 : vector<8x128xf32>
    %228 = math.tanh %227 : vector<8x128xf32>
    %cst_85 = arith.constant 1.000000e+00 : f32
    %229 = vector.broadcast %cst_85 : f32 to vector<8x128xf32>
    %230 = arith.addf %229, %228 : vector<8x128xf32>
    %cst_86 = arith.constant 5.000000e-01 : f32
    %231 = vector.broadcast %cst_86 : f32 to vector<8x128xf32>
    %232 = arith.mulf %231, %230 : vector<8x128xf32>
    %233 = vector.extract_strided_slice %204 {offsets = [0, 256], sizes = [8, 128], strides = [1, 1]} : vector<8x640xf32> to vector<8x128xf32>
    %234 = math.tanh %233 : vector<8x128xf32>
    %235 = vector.extract_strided_slice %204 {offsets = [0, 384], sizes = [8, 128], strides = [1, 1]} : vector<8x640xf32> to vector<8x128xf32>
    %cst_87 = arith.constant 5.000000e-01 : f32
    %236 = vector.broadcast %cst_87 : f32 to vector<8x128xf32>
    %237 = arith.mulf %236, %235 : vector<8x128xf32>
    %238 = math.tanh %237 : vector<8x128xf32>
    %cst_88 = arith.constant 1.000000e+00 : f32
    %239 = vector.broadcast %cst_88 : f32 to vector<8x128xf32>
    %240 = arith.addf %239, %238 : vector<8x128xf32>
    %cst_89 = arith.constant 5.000000e-01 : f32
    %241 = vector.broadcast %cst_89 : f32 to vector<8x128xf32>
    %242 = arith.mulf %241, %240 : vector<8x128xf32>
    %243 = arith.mulf %232, %198 : vector<8x128xf32>
    %244 = arith.mulf %224, %234 : vector<8x128xf32>
    %245 = arith.addf %243, %244 : vector<8x128xf32>
    %246 = math.tanh %245 : vector<8x128xf32>
    %247 = arith.mulf %242, %246 : vector<8x128xf32>
    %248 = arith.truncf %247 : vector<8x128xf32> to vector<8x128xbf16>
    %cst_90 = arith.constant dense<0.000000e+00> : vector<8x640xf32>
    %249 = tpu.matmul %248, %10, %cst_90 {dimension_numbers = #tpu.dot_dimension_numbers<[1], [0], [0], [1], [0, 0, 1, 1], [], []>} : vector<8x128xbf16>, vector<128x640xbf16>, vector<8x640xf32> -> vector<8x640xf32>
    %c40 = arith.constant 40 : index
    %c0_91 = arith.constant 0 : index
    %250 = vector.load %arg12[%c40, %c0_91] : memref<64x640xf32, #tpu.memory_space<vmem>>, vector<8x640xf32>
    %251 = arith.addf %250, %249 : vector<8x640xf32>
    %252 = vector.extract_strided_slice %251 {offsets = [0, 512], sizes = [8, 128], strides = [1, 1]} : vector<8x640xf32> to vector<8x128xf32>
    %cst_92 = arith.constant dense<0xFF800000> : vector<8xf32>
    %253 = vector.multi_reduction <maximumf>, %252, %cst_92 [1] : vector<8x128xf32> to vector<8xf32>
    %254 = vector.shape_cast %253 : vector<8xf32> to vector<8x1xf32>
    %255 = vector.broadcast %254 : vector<8x1xf32> to vector<8x128xf32>
    %256 = arith.subf %252, %255 : vector<8x128xf32>
    %257 = math.exp %256 : vector<8x128xf32>
    %cst_93 = arith.constant dense<0.000000e+00> : vector<8xf32>
    %258 = vector.multi_reduction <add>, %257, %cst_93 [1] : vector<8x128xf32> to vector<8xf32>
    %259 = vector.shape_cast %258 : vector<8xf32> to vector<8x1xf32>
    %260 = math.log %259 : vector<8x1xf32>
    %261 = vector.broadcast %260 : vector<8x1xf32> to vector<8x128xf32>
    %262 = arith.subf %256, %261 : vector<8x128xf32>
    %c40_94 = arith.constant 40 : index
    %c0_95 = arith.constant 0 : index
    %263 = vector.load %arg7[%c40_94, %c0_95] : memref<64x128xf32, #tpu.memory_space<vmem>>, vector<8x128xf32>
    tpu.vector_store %arg7[%c40_94, %c0_95], %262 {strides = array<i32>} : memref<64x128xf32, #tpu.memory_space<vmem>>, vector<8x128xf32>,
    %264 = vector.extract_strided_slice %251 {offsets = [0, 0], sizes = [8, 128], strides = [1, 1]} : vector<8x640xf32> to vector<8x128xf32>
    %cst_96 = arith.constant 5.000000e-01 : f32
    %265 = vector.broadcast %cst_96 : f32 to vector<8x128xf32>
    %266 = arith.mulf %265, %264 : vector<8x128xf32>
    %267 = math.tanh %266 : vector<8x128xf32>
    %cst_97 = arith.constant 1.000000e+00 : f32
    %268 = vector.broadcast %cst_97 : f32 to vector<8x128xf32>
    %269 = arith.addf %268, %267 : vector<8x128xf32>
    %cst_98 = arith.constant 5.000000e-01 : f32
    %270 = vector.broadcast %cst_98 : f32 to vector<8x128xf32>
    %271 = arith.mulf %270, %269 : vector<8x128xf32>
    %272 = vector.extract_strided_slice %251 {offsets = [0, 128], sizes = [8, 128], strides = [1, 1]} : vector<8x640xf32> to vector<8x128xf32>
    %cst_99 = arith.constant 5.000000e-01 : f32
    %273 = vector.broadcast %cst_99 : f32 to vector<8x128xf32>
    %274 = arith.mulf %273, %272 : vector<8x128xf32>
    %275 = math.tanh %274 : vector<8x128xf32>
    %cst_100 = arith.constant 1.000000e+00 : f32
    %276 = vector.broadcast %cst_100 : f32 to vector<8x128xf32>
    %277 = arith.addf %276, %275 : vector<8x128xf32>
    %cst_101 = arith.constant 5.000000e-01 : f32
    %278 = vector.broadcast %cst_101 : f32 to vector<8x128xf32>
    %279 = arith.mulf %278, %277 : vector<8x128xf32>
    %280 = vector.extract_strided_slice %251 {offsets = [0, 256], sizes = [8, 128], strides = [1, 1]} : vector<8x640xf32> to vector<8x128xf32>
    %281 = math.tanh %280 : vector<8x128xf32>
    %282 = vector.extract_strided_slice %251 {offsets = [0, 384], sizes = [8, 128], strides = [1, 1]} : vector<8x640xf32> to vector<8x128xf32>
    %cst_102 = arith.constant 5.000000e-01 : f32
    %283 = vector.broadcast %cst_102 : f32 to vector<8x128xf32>
    %284 = arith.mulf %283, %282 : vector<8x128xf32>
    %285 = math.tanh %284 : vector<8x128xf32>
    %cst_103 = arith.constant 1.000000e+00 : f32
    %286 = vector.broadcast %cst_103 : f32 to vector<8x128xf32>
    %287 = arith.addf %286, %285 : vector<8x128xf32>
    %cst_104 = arith.constant 5.000000e-01 : f32
    %288 = vector.broadcast %cst_104 : f32 to vector<8x128xf32>
    %289 = arith.mulf %288, %287 : vector<8x128xf32>
    %290 = arith.mulf %279, %245 : vector<8x128xf32>
    %291 = arith.mulf %271, %281 : vector<8x128xf32>
    %292 = arith.addf %290, %291 : vector<8x128xf32>
    %293 = math.tanh %292 : vector<8x128xf32>
    %294 = arith.mulf %289, %293 : vector<8x128xf32>
    %295 = arith.truncf %294 : vector<8x128xf32> to vector<8x128xbf16>
    %cst_105 = arith.constant dense<0.000000e+00> : vector<8x640xf32>
    %296 = tpu.matmul %295, %10, %cst_105 {dimension_numbers = #tpu.dot_dimension_numbers<[1], [0], [0], [1], [0, 0, 1, 1], [], []>} : vector<8x128xbf16>, vector<128x640xbf16>, vector<8x640xf32> -> vector<8x640xf32>
    %c48 = arith.constant 48 : index
    %c0_106 = arith.constant 0 : index
    %297 = vector.load %arg12[%c48, %c0_106] : memref<64x640xf32, #tpu.memory_space<vmem>>, vector<8x640xf32>
    %298 = arith.addf %297, %296 : vector<8x640xf32>
    %299 = vector.extract_strided_slice %298 {offsets = [0, 512], sizes = [8, 128], strides = [1, 1]} : vector<8x640xf32> to vector<8x128xf32>
    %cst_107 = arith.constant dense<0xFF800000> : vector<8xf32>
    %300 = vector.multi_reduction <maximumf>, %299, %cst_107 [1] : vector<8x128xf32> to vector<8xf32>
    %301 = vector.shape_cast %300 : vector<8xf32> to vector<8x1xf32>
    %302 = vector.broadcast %301 : vector<8x1xf32> to vector<8x128xf32>
    %303 = arith.subf %299, %302 : vector<8x128xf32>
    %304 = math.exp %303 : vector<8x128xf32>
    %cst_108 = arith.constant dense<0.000000e+00> : vector<8xf32>
    %305 = vector.multi_reduction <add>, %304, %cst_108 [1] : vector<8x128xf32> to vector<8xf32>
    %306 = vector.shape_cast %305 : vector<8xf32> to vector<8x1xf32>
    %307 = math.log %306 : vector<8x1xf32>
    %308 = vector.broadcast %307 : vector<8x1xf32> to vector<8x128xf32>
    %309 = arith.subf %303, %308 : vector<8x128xf32>
    %c48_109 = arith.constant 48 : index
    %c0_110 = arith.constant 0 : index
    %310 = vector.load %arg7[%c48_109, %c0_110] : memref<64x128xf32, #tpu.memory_space<vmem>>, vector<8x128xf32>
    tpu.vector_store %arg7[%c48_109, %c0_110], %309 {strides = array<i32>} : memref<64x128xf32, #tpu.memory_space<vmem>>, vector<8x128xf32>,
    %311 = vector.extract_strided_slice %298 {offsets = [0, 0], sizes = [8, 128], strides = [1, 1]} : vector<8x640xf32> to vector<8x128xf32>
    %cst_111 = arith.constant 5.000000e-01 : f32
    %312 = vector.broadcast %cst_111 : f32 to vector<8x128xf32>
    %313 = arith.mulf %312, %311 : vector<8x128xf32>
    %314 = math.tanh %313 : vector<8x128xf32>
    %cst_112 = arith.constant 1.000000e+00 : f32
    %315 = vector.broadcast %cst_112 : f32 to vector<8x128xf32>
    %316 = arith.addf %315, %314 : vector<8x128xf32>
    %cst_113 = arith.constant 5.000000e-01 : f32
    %317 = vector.broadcast %cst_113 : f32 to vector<8x128xf32>
    %318 = arith.mulf %317, %316 : vector<8x128xf32>
    %319 = vector.extract_strided_slice %298 {offsets = [0, 128], sizes = [8, 128], strides = [1, 1]} : vector<8x640xf32> to vector<8x128xf32>
    %cst_114 = arith.constant 5.000000e-01 : f32
    %320 = vector.broadcast %cst_114 : f32 to vector<8x128xf32>
    %321 = arith.mulf %320, %319 : vector<8x128xf32>
    %322 = math.tanh %321 : vector<8x128xf32>
    %cst_115 = arith.constant 1.000000e+00 : f32
    %323 = vector.broadcast %cst_115 : f32 to vector<8x128xf32>
    %324 = arith.addf %323, %322 : vector<8x128xf32>
    %cst_116 = arith.constant 5.000000e-01 : f32
    %325 = vector.broadcast %cst_116 : f32 to vector<8x128xf32>
    %326 = arith.mulf %325, %324 : vector<8x128xf32>
    %327 = vector.extract_strided_slice %298 {offsets = [0, 256], sizes = [8, 128], strides = [1, 1]} : vector<8x640xf32> to vector<8x128xf32>
    %328 = math.tanh %327 : vector<8x128xf32>
    %329 = vector.extract_strided_slice %298 {offsets = [0, 384], sizes = [8, 128], strides = [1, 1]} : vector<8x640xf32> to vector<8x128xf32>
    %cst_117 = arith.constant 5.000000e-01 : f32
    %330 = vector.broadcast %cst_117 : f32 to vector<8x128xf32>
    %331 = arith.mulf %330, %329 : vector<8x128xf32>
    %332 = math.tanh %331 : vector<8x128xf32>
    %cst_118 = arith.constant 1.000000e+00 : f32
    %333 = vector.broadcast %cst_118 : f32 to vector<8x128xf32>
    %334 = arith.addf %333, %332 : vector<8x128xf32>
    %cst_119 = arith.constant 5.000000e-01 : f32
    %335 = vector.broadcast %cst_119 : f32 to vector<8x128xf32>
    %336 = arith.mulf %335, %334 : vector<8x128xf32>
    %337 = arith.mulf %326, %292 : vector<8x128xf32>
    %338 = arith.mulf %318, %328 : vector<8x128xf32>
    %339 = arith.addf %337, %338 : vector<8x128xf32>
    %340 = math.tanh %339 : vector<8x128xf32>
    %341 = arith.mulf %336, %340 : vector<8x128xf32>
    %342 = arith.truncf %341 : vector<8x128xf32> to vector<8x128xbf16>
    %cst_120 = arith.constant dense<0.000000e+00> : vector<8x640xf32>
    %343 = tpu.matmul %342, %10, %cst_120 {dimension_numbers = #tpu.dot_dimension_numbers<[1], [0], [0], [1], [0, 0, 1, 1], [], []>} : vector<8x128xbf16>, vector<128x640xbf16>, vector<8x640xf32> -> vector<8x640xf32>
    %c56 = arith.constant 56 : index
    %c0_121 = arith.constant 0 : index
    %344 = vector.load %arg12[%c56, %c0_121] : memref<64x640xf32, #tpu.memory_space<vmem>>, vector<8x640xf32>
    %345 = arith.addf %344, %343 : vector<8x640xf32>
    %346 = vector.extract_strided_slice %345 {offsets = [0, 512], sizes = [8, 128], strides = [1, 1]} : vector<8x640xf32> to vector<8x128xf32>
    %cst_122 = arith.constant dense<0xFF800000> : vector<8xf32>
    %347 = vector.multi_reduction <maximumf>, %346, %cst_122 [1] : vector<8x128xf32> to vector<8xf32>
    %348 = vector.shape_cast %347 : vector<8xf32> to vector<8x1xf32>
    %349 = vector.broadcast %348 : vector<8x1xf32> to vector<8x128xf32>
    %350 = arith.subf %346, %349 : vector<8x128xf32>
    %351 = math.exp %350 : vector<8x128xf32>
    %cst_123 = arith.constant dense<0.000000e+00> : vector<8xf32>
    %352 = vector.multi_reduction <add>, %351, %cst_123 [1] : vector<8x128xf32> to vector<8xf32>
    %353 = vector.shape_cast %352 : vector<8xf32> to vector<8x1xf32>
    %354 = math.log %353 : vector<8x1xf32>
    %355 = vector.broadcast %354 : vector<8x1xf32> to vector<8x128xf32>
    %356 = arith.subf %350, %355 : vector<8x128xf32>
    %c56_124 = arith.constant 56 : index
    %c0_125 = arith.constant 0 : index
    %357 = vector.load %arg7[%c56_124, %c0_125] : memref<64x128xf32, #tpu.memory_space<vmem>>, vector<8x128xf32>
    tpu.vector_store %arg7[%c56_124, %c0_125], %356 {strides = array<i32>} : memref<64x128xf32, #tpu.memory_space<vmem>>, vector<8x128xf32>,
    %358 = vector.extract_strided_slice %345 {offsets = [0, 0], sizes = [8, 128], strides = [1, 1]} : vector<8x640xf32> to vector<8x128xf32>
    %cst_126 = arith.constant 5.000000e-01 : f32
    %359 = vector.broadcast %cst_126 : f32 to vector<8x128xf32>
    %360 = arith.mulf %359, %358 : vector<8x128xf32>
    %361 = math.tanh %360 : vector<8x128xf32>
    %cst_127 = arith.constant 1.000000e+00 : f32
    %362 = vector.broadcast %cst_127 : f32 to vector<8x128xf32>
    %363 = arith.addf %362, %361 : vector<8x128xf32>
    %cst_128 = arith.constant 5.000000e-01 : f32
    %364 = vector.broadcast %cst_128 : f32 to vector<8x128xf32>
    %365 = arith.mulf %364, %363 : vector<8x128xf32>
    %366 = vector.extract_strided_slice %345 {offsets = [0, 128], sizes = [8, 128], strides = [1, 1]} : vector<8x640xf32> to vector<8x128xf32>
    %cst_129 = arith.constant 5.000000e-01 : f32
    %367 = vector.broadcast %cst_129 : f32 to vector<8x128xf32>
    %368 = arith.mulf %367, %366 : vector<8x128xf32>
    %369 = math.tanh %368 : vector<8x128xf32>
    %cst_130 = arith.constant 1.000000e+00 : f32
    %370 = vector.broadcast %cst_130 : f32 to vector<8x128xf32>
    %371 = arith.addf %370, %369 : vector<8x128xf32>
    %cst_131 = arith.constant 5.000000e-01 : f32
    %372 = vector.broadcast %cst_131 : f32 to vector<8x128xf32>
    %373 = arith.mulf %372, %371 : vector<8x128xf32>
    %374 = vector.extract_strided_slice %345 {offsets = [0, 256], sizes = [8, 128], strides = [1, 1]} : vector<8x640xf32> to vector<8x128xf32>
    %375 = math.tanh %374 : vector<8x128xf32>
    %376 = vector.extract_strided_slice %345 {offsets = [0, 384], sizes = [8, 128], strides = [1, 1]} : vector<8x640xf32> to vector<8x128xf32>
    %cst_132 = arith.constant 5.000000e-01 : f32
    %377 = vector.broadcast %cst_132 : f32 to vector<8x128xf32>
    %378 = arith.mulf %377, %376 : vector<8x128xf32>
    %379 = math.tanh %378 : vector<8x128xf32>
    %cst_133 = arith.constant 1.000000e+00 : f32
    %380 = vector.broadcast %cst_133 : f32 to vector<8x128xf32>
    %381 = arith.addf %380, %379 : vector<8x128xf32>
    %cst_134 = arith.constant 5.000000e-01 : f32
    %382 = vector.broadcast %cst_134 : f32 to vector<8x128xf32>
    %383 = arith.mulf %382, %381 : vector<8x128xf32>
    %384 = arith.mulf %373, %339 : vector<8x128xf32>
    %385 = arith.mulf %365, %375 : vector<8x128xf32>
    %386 = arith.addf %384, %385 : vector<8x128xf32>
    %387 = math.tanh %386 : vector<8x128xf32>
    %388 = arith.mulf %383, %387 : vector<8x128xf32>
    %c0_135 = arith.constant 0 : index
    %c0_136 = arith.constant 0 : index
    %389 = vector.load %arg10[%c0_135, %c0_136] : memref<8x128xf32, #tpu.memory_space<vmem>>, vector<8x128xf32>
    tpu.vector_store %arg10[%c0_135, %c0_136], %388 {strides = array<i32>} : memref<8x128xf32, #tpu.memory_space<vmem>>, vector<8x128xf32>,
    %c0_137 = arith.constant 0 : index
    %c0_138 = arith.constant 0 : index
    %390 = vector.load %arg11[%c0_137, %c0_138] : memref<8x128xf32, #tpu.memory_space<vmem>>, vector<8x128xf32>
    tpu.vector_store %arg11[%c0_137, %c0_138], %386 {strides = array<i32>} : memref<8x128xf32, #tpu.memory_space<vmem>>, vector<8x128xf32>,
    %c0_i32_139 = arith.constant 0 : i32
    %391 = arith.cmpi eq, %arg0, %c0_i32_139 : i32
    %392 = arith.extui %391 : i1 to i32
    %c0_i32_140 = arith.constant 0 : i32
    %393 = arith.cmpi ne, %392, %c0_i32_140 : i32
    scf.if %393 {
      %c0_141 = arith.constant 0 : index
      %c0_142 = arith.constant 0 : index
      %394 = vector.load %arg8[%c0_141, %c0_142] : memref<8x128xf32, #tpu.memory_space<vmem>>, vector<8x128xf32>
      tpu.vector_store %arg8[%c0_141, %c0_142], %388 {strides = array<i32>} : memref<8x128xf32, #tpu.memory_space<vmem>>, vector<8x128xf32>,
      %c0_143 = arith.constant 0 : index
      %c0_144 = arith.constant 0 : index
      %395 = vector.load %arg9[%c0_143, %c0_144] : memref<8x128xf32, #tpu.memory_space<vmem>>, vector<8x128xf32>
      tpu.vector_store %arg9[%c0_143, %c0_144], %386 {strides = array<i32>} : memref<8x128xf32, #tpu.memory_space<vmem>>, vector<8x128xf32>,
    } else {
    }
    return
  }
  func.func @transform_0(%arg0: i32) -> (i32, i32) {
    %c0_i32 = arith.constant 0 : i32
    %c0_i32_0 = arith.constant 0 : i32
    return %arg0, %c0_i32 : i32, i32
  }
  func.func @transform_1(%arg0: i32) -> (i32, i32) {
    %c0_i32 = arith.constant 0 : i32
    %c0_i32_0 = arith.constant 0 : i32
    %c0_i32_1 = arith.constant 0 : i32
    return %c0_i32, %c0_i32_0 : i32, i32
  }
  func.func @transform_2(%arg0: i32) -> (i32, i32) {
    %c0_i32 = arith.constant 0 : i32
    %c0_i32_0 = arith.constant 0 : i32
    %c0_i32_1 = arith.constant 0 : i32
    return %c0_i32, %c0_i32_0 : i32, i32
  }
  func.func @transform_3(%arg0: i32) -> (i32, i32) {
    %c0_i32 = arith.constant 0 : i32
    %c0_i32_0 = arith.constant 0 : i32
    %c0_i32_1 = arith.constant 0 : i32
    return %c0_i32, %c0_i32_0 : i32, i32
  }
  func.func @transform_4(%arg0: i32) -> (i32, i32) {
    %c0_i32 = arith.constant 0 : i32
    %c0_i32_0 = arith.constant 0 : i32
    %c0_i32_1 = arith.constant 0 : i32
    return %c0_i32, %c0_i32_0 : i32, i32
  }
  func.func @transform_5(%arg0: i32) -> (i32, i32) {
    %c0_i32 = arith.constant 0 : i32
    %c0_i32_0 = arith.constant 0 : i32
    %c0_i32_1 = arith.constant 0 : i32
    return %c0_i32, %c0_i32_0 : i32, i32
  }
  func.func @transform_6(%arg0: i32) -> (i32, i32) {
    %c0_i32 = arith.constant 0 : i32
    %c0_i32_0 = arith.constant 0 : i32
    return %arg0, %c0_i32 : i32, i32
  }
  func.func @transform_7(%arg0: i32) -> (i32, i32) {
    %c0_i32 = arith.constant 0 : i32
    %c0_i32_0 = arith.constant 0 : i32
    %c0_i32_1 = arith.constant 0 : i32
    return %c0_i32, %c0_i32_0 : i32, i32
  }
  func.func @transform_8(%arg0: i32) -> (i32, i32) {
    %c0_i32 = arith.constant 0 : i32
    %c0_i32_0 = arith.constant 0 : i32
    %c0_i32_1 = arith.constant 0 : i32
    return %c0_i32, %c0_i32_0 : i32, i32
  }
}

</mosaic_0001>

<bundles_post_ra>
// kernel: tpu_custom_call.1
= control target key start
LH: loop header
LB: loop body
LE: loop exit
PB: predicated region body
PF: predicated region fallthrough
CT: control target
= control target key end

     0   :  { %14 = vsyncpa [#allocation6], 0  ;;  %s3693_s0 = inlined_call_operand.vmem [shape: bf16[64,32], index: 0, kind: input, shape index: {}]   ;;  %s3694_s1 = inlined_call_operand.vmem [shape: f32[8,128], index: 1, kind: input, shape index: {}]   ;;  %s3695_s2 = inlined_call_operand.vmem [shape: f32[8,128], index: 2, kind: input, shape index: {}]   ;;  %s3696_s3 = inlined_call_operand.hbm [shape: bf16[32,640], index: 3, kind: input, shape index: {}]   ;;  %s3697_s4 = inlined_call_operand.hbm [shape: bf16[128,640], index: 4, kind: input, shape index: {}]   ;;  %s3698_s5 = inlined_call_operand.vmem [shape: f32[1,640], index: 5, kind: input, shape index: {}]   ;;  %s3699_s6 = inlined_call_operand.hbm [shape: f32[64,128], index: 6, kind: output, shape index: {0}]   ;;  %s3700_s7 = inlined_call_operand.hbm [shape: f32[8,128], index: 7, kind: output, shape index: {1}]   ;;  %s3701_s8 = inlined_call_operand.hbm [shape: f32[8,128], index: 8, kind: output, shape index: {2}]  }
   0x1   :  { %15 = vsyncpa [#allocation9], 0 }
   0x2   :  { %16 = vsyncpa [#allocation7], 0 }
   0x3   :  { %17 = vsyncpa [#allocation12], 0  ;;  %s2730_s27 = smov [#allocation5]   ;;  %s2612_s9 = scalar_lea.hbm %s3696_s3, 1280 }
   0x4   :  { %s29_s28 = sshll.u32 %s2730_s27, 4  ;;  %p2613_p0 = scmp.ne.s32.totalorder %s3696_s3, %s2612_s9  ;;  %s30_s28 = int_to_ptr.vmem [resolvable:$true] %s29_s28 }
   0x5   :  { %p2616_p1 = scmp.lt.u32.totalorder %s2612_s9, %s3696_s3 }
   0x7   :  { %p2618_p2 = pnand %p2616_p1, %p2613_p0 }
   0x9   :  { %2621 = shalt.err (!%p2618_p2)
}
   0xa   :  { %s2622_s14 = scalar_lea.vmem %s30_s28, 1280  ;;  %p2627_p4 = scmp.lt.s32.totalorder %s30_s28, %s30_s28 }
   0xb   :  { %p2623_p3 = scmp.ne.s32.totalorder %s30_s28, %s2622_s14  ;;  %p2628_p5 = scmp.lt.s32.totalorder %s2622_s14, %s2622_s14 }
   0xd   :  { %p2629_p6 = por %p2628_p5, %p2627_p4 }
   0xf   :  { %p2630_p7 = pnand %p2629_p6, %p2623_p3 }
  0x11   :  { %2633 = shalt.err (!%p2630_p7)
}
  0x12   :  { %s2731_s15 = smov 320   ;;  %s2732_s16 = smov 20  }
  0x13   :  { %35 = dma.hbm_to_vmem [thread:$0]  %s3696_s3, 1280, %s30_s28, [#allocation6], %s2731_s15, %s2731_s15, %s2732_s16  }
  0x14   :  { %s2733_s19 = smov [#allocation8]   ;;  %s2634_s23 = scalar_lea.hbm %s3697_s4, 5120 }
  0x15   :  { %s41_s20 = sshll.u32 %s2733_s19, 4  ;;  %p2635_p8 = scmp.ne.s32.totalorder %s3697_s4, %s2634_s23  ;;  %s42_s20 = int_to_ptr.vmem [resolvable:$true] %s41_s20 }
  0x16   :  { %p2638_p9 = scmp.lt.u32.totalorder %s2634_s23, %s3697_s4 }
  0x18   :  { %p2640_p10 = pnand %p2638_p9, %p2635_p8 }
  0x1a   :  { %2643 = shalt.err (!%p2640_p10)
}
  0x1b   :  { %s2644_s29 = scalar_lea.vmem %s42_s20, 5120  ;;  %p2649_p12 = scmp.lt.s32.totalorder %s42_s20, %s42_s20 }
  0x1c   :  { %p2645_p11 = scmp.ne.s32.totalorder %s42_s20, %s2644_s29  ;;  %p2650_p13 = scmp.lt.s32.totalorder %s2644_s29, %s2644_s29 }
  0x1e   :  { %p2651_p0 = por %p2650_p13, %p2649_p12 }
  0x20   :  { %p2652_p1 = pnand %p2651_p0, %p2645_p11 }
  0x22   :  { %2655 = shalt.err (!%p2652_p1)
}
  0x23   :  { %47 = dma.hbm_to_vmem [thread:$0]  %s3697_s4, 5120, %s42_s20, [#allocation9], %s2731_s15, %s2731_s15, %s2732_s16  }
  0x24   :  { %2722 = dma.done.wait [#allocation6], 1280  }
  0x25   :  { %2723 = vsyncadd [#allocation6], 4294966016 }
  0x26   :  { %2724 = dma.done.wait [#allocation9], 5120  }
  0x27   :  { %2725 = vsyncadd [#allocation9], 4294962176  ;;  %v3702_v0 = vmov 0   ;;  %v2386_v1 = vld [vmem:[#allocation5 + $0x4] ss:$20 sps:$4 sm:$0xff]   ;;  %vm184_vm0 = vcmask 261120   ;;  %v87_v58 = vlaneseq }
  0x28   :  { %229 = vmatprep.mubr.bf16.mxu0 %v3702_v0  ;;  %249 = vmatprep.mubr.bf16.mxu1 %v3702_v0  ;;  %v2388_v2 = vld [vmem:[#allocation5] ss:$20 sps:$4 sm:$0xff]   ;;  %v2391_v4 = vld [vmem:[#allocation5 + $0x28] ss:$20 sps:$4 sm:$0xff]   ;;  %v2397_v8 = vld [vmem:[#allocation5 + $0x10] ss:$20 sps:$4 sm:$0xff]  }
  0x29   :  { %197 = vmatprep.subr.bf16.mxu0 %v2386_v1  ;;  %2370 = vmatprep.subr.bf16.mxu1 %v2386_v1  ;;  %v2389_v3 = vld [vmem:[#allocation5 + $0x2c] ss:$20 sps:$4 sm:$0xff]   ;;  %v2819_v6 = vld [vmem:[%s3693_s0 + $0x10] sm:$0xff]   ;;  %v2394_v9 = vld [vmem:[#allocation5 + $0x8] ss:$20 sps:$4 sm:$0xff]   ;;  %v3704_v50 = vmov 0.0  }
  0x2a   :  { %198 = vmatpush1.bf16.msra.mxu0 %v2388_v2  ;;  %2372 = vmatpush1.bf16.msra.mxu1 %v2388_v2  ;;  %v2392_v5 = vld [vmem:[%s3693_s0] sm:$0xff]   ;;  %v2402_v11 = vld [vmem:[#allocation5 + $0x34] ss:$20 sps:$4 sm:$0xff]   ;;  %v2403_v12 = vld [vmem:[#allocation5 + $0x38] ss:$20 sps:$4 sm:$0xff]   ;;  %vm2736_vm1 = vmmov 0  }
  0x2b   :  { %199 = vmatprep.subr.bf16.mxu0 %v2389_v3  ;;  %2371 = vmatprep.subr.bf16.mxu1 %v2389_v3  ;;  %v2396_v7 = vld [vmem:[#allocation5 + $0xc] ss:$20 sps:$4 sm:$0xff]   ;;  %v2400_v10 = vld [vmem:[#allocation5 + $0x30] ss:$20 sps:$4 sm:$0xff]   ;;  %v2826_v13 = vld [vmem:[#allocation8 + $0x4] ss:$20 sps:$4 sm:$0xff]  }
  0x2c   :  { %3718 = vst [vmem:[#allocation18_spill] sm:$0xff] %v2826_v13  ;;  %v2398_v14 = vld [vmem:[%s3693_s0 + $0x8] sm:$0xff]   ;;  %v2834_v15 = vld [vmem:[%s3693_s0 + $0x18] sm:$0xff]   ;;  %v2845_v17 = vld [vmem:[#allocation8] ss:$20 sps:$4 sm:$0xff]   ;;  %v88_v59 = vshrl.u32 %v87_v58, 7 }
  0x2d   :  { %v2837_v16 = vld [vmem:[#allocation8 + $0xc] ss:$20 sps:$4 sm:$0xff]   ;;  %v2847_v18 = vld [vmem:[#allocation8 + $0x8] ss:$20 sps:$4 sm:$0xff]   ;;  %v2857_v22 = vld [vmem:[#allocation8 + $0x30] ss:$20 sps:$4 sm:$0xff]  }
  0x2e   :  { %200 = vmatpush1.bf16.msra.mxu0 %v2391_v4  ;;  %2373 = vmatpush1.bf16.msra.mxu1 %v2391_v4  ;;  %v2849_v19 = vld [vmem:[#allocation8 + $0x2c] ss:$20 sps:$4 sm:$0xff]   ;;  %v2851_v20 = vld [vmem:[#allocation8 + $0x34] ss:$20 sps:$4 sm:$0xff]   ;;  %v2865_v24 = vld [vmem:[#allocation8 + $0x5c] ss:$20 sps:$4 sm:$0xff]  }
  0x2f   :  { %270 = vmatprep.subr.bf16.mxu1 %v2396_v7  ;;  %2198 = vmatprep.subr.bf16.mxu0 %v2397_v8  ;;  %v2855_v21 = vld [vmem:[#allocation8 + $0x28] ss:$20 sps:$4 sm:$0xff]   ;;  %v2870_v25 = vld [vmem:[#allocation8 + $0x50] ss:$20 sps:$4 sm:$0xff]   ;;  %v2874_v26 = vld [vmem:[#allocation8 + $0x58] ss:$20 sps:$4 sm:$0xff]  }
  0x30   :  { %v2861_v23 = vld [vmem:[#allocation8 + $0x54] ss:$20 sps:$4 sm:$0xff]   ;;  %v2878_v27 = vld [vmem:[#allocation8 + $0x7c] ss:$20 sps:$4 sm:$0xff]   ;;  %v2880_v28 = vld [vmem:[#allocation8 + $0x84] ss:$20 sps:$4 sm:$0xff]  }
  0x31   :  { %2068 = vmatmul.mubr.msk.bf16.vlgmr.msra.gmra.mrb[0].mxu0 %vm184_vm0, %v2392_v5  ;;  %2070 = vmatmul.mubr.msk.bf16.vlgmr.msra.gmra.mrb[0].mxu1 %vm184_vm0, %v2819_v6  ;;  %v2882_v29 = vld [vmem:[#allocation8 + $0x78] ss:$20 sps:$4 sm:$0xff]   ;;  %v2885_v30 = vld [vmem:[#allocation8 + $0x80] ss:$20 sps:$4 sm:$0xff]   ;;  %v2901_v34 = vld [vmem:[#allocation8 + $0xa8] ss:$20 sps:$4 sm:$0xff]  }
  0x32   :  { %271 = vmatpush1.bf16.msra.mxu1 %v2394_v9  ;;  %239 = vmatprep.mubr.bf16.mxu0 %v3702_v0  ;;  %v2891_v31 = vld [vmem:[#allocation8 + $0xa4] ss:$20 sps:$4 sm:$0xff]   ;;  %v2895_v32 = vld [vmem:[#allocation8 + $0xac] ss:$20 sps:$4 sm:$0xff]   ;;  %v2909_v36 = vld [vmem:[#allocation8 + $0xd4] ss:$20 sps:$4 sm:$0xff]  }
  0x33   :  { %259 = vmatprep.mubr.bf16.mxu1 %v3702_v0  ;;  %272 = vmatprep.subr.bf16.mxu1 %v2402_v11  ;;  %v2898_v33 = vld [vmem:[#allocation8 + $0xa0] ss:$20 sps:$4 sm:$0xff]   ;;  %v2915_v37 = vld [vmem:[#allocation8 + $0xc8] ss:$20 sps:$4 sm:$0xff]   ;;  %v2917_v38 = vld [vmem:[#allocation8 + $0xd0] ss:$20 sps:$4 sm:$0xff]  }
  0x34   :  { %2199 = vmatpush3.bf16.msra.mxu0 %v2397_v8  ;;  %v2905_v35 = vld [vmem:[#allocation8 + $0xcc] ss:$20 sps:$4 sm:$0xff]   ;;  %v2921_v39 = vld [vmem:[#allocation8 + $0xf4] ss:$20 sps:$4 sm:$0xff]   ;;  %v2923_v40 = vld [vmem:[#allocation8 + $0xfc] ss:$20 sps:$4 sm:$0xff]  }
  0x35   :  { %2200 = vmatprep.subr.bf16.mxu0 %v2403_v12  ;;  %v2928_v41 = vld [vmem:[#allocation8 + $0xf0] ss:$20 sps:$4 sm:$0xff]   ;;  %v2930_v42 = vld [vmem:[#allocation8 + $0xf8] ss:$20 sps:$4 sm:$0xff]   ;;  %v2944_v46 = vld [vmem:[#allocation8 + $0x120] ss:$20 sps:$4 sm:$0xff]  }
  0x36   :  { %273 = vmatpush1.bf16.msra.mxu1 %v2400_v10  ;;  %3719 = vst [vmem:[#allocation19_spill] sm:$0xff] %v2930_v42  ;;  %v2934_v43 = vld [vmem:[#allocation8 + $0x11c] ss:$20 sps:$4 sm:$0xff]   ;;  %v2936_v44 = vld [vmem:[#allocation8 + $0x124] ss:$20 sps:$4 sm:$0xff]   ;;  %3721 = vst [vmem:[#allocation21_spill] sm:$0xff] %v2944_v46 }
  0x37   :  { %707 = vmatprep.subr.bf16.mxu1 %v2826_v13  ;;  %3720 = vst [vmem:[#allocation20_spill] sm:$0xff] %v2936_v44  ;;  %v2942_v45 = vld [vmem:[#allocation8 + $0x118] ss:$20 sps:$4 sm:$0xff]   ;;  %v61_v47 = vld [vmem:[%s3694_s1] sm:$0xff]  ;;  %v2974_v53 = vld [vmem:[#allocation8 + $0x88] ss:$20 sps:$4 sm:$0xff]  }
  0x38   :  { %2201 = vmatpush3.bf16.msra.mxu0 %v2403_v12  ;;  %v498_v48 = vpack.c.bf16 %v61_v47, %v61_v47  ;;  %v2954_v49 = vld [vmem:[#allocation8 + $0x10] ss:$20 sps:$4 sm:$0xff]   ;;  %v2959_v51 = vld [vmem:[#allocation8 + $0x38] ss:$20 sps:$4 sm:$0xff]   ;;  %v2968_v52 = vld [vmem:[#allocation8 + $0x60] ss:$20 sps:$4 sm:$0xff]  }
  0x39   :  { %2069 = vmatmul.mubr.msk.bf16.gmra.mrb[4].mxu0 %vm184_vm0, %v2398_v14  ;;  %2071 = vmatmul.mubr.msk.bf16.gmra.mrb[4].mxu1 %vm184_vm0, %v2834_v15  ;;  %v2980_v54 = vld [vmem:[#allocation8 + $0xb0] ss:$20 sps:$4 sm:$0xff]   ;;  %v2986_v55 = vld [vmem:[#allocation8 + $0xd8] ss:$20 sps:$4 sm:$0xff]   ;;  %v2992_v56 = vld [vmem:[#allocation8 + $0x100] ss:$20 sps:$4 sm:$0xff]  }
  0x3a   :  { %302 = vmatprep.mubr.bf16.mxu1 %v3702_v0  ;;  %2202 = vmatprep.mubr.msk.bf16.mxu0 %vm184_vm0, %v2392_v5  ;;  %v2998_v57 = vld [vmem:[#allocation8 + $0x128] ss:$20 sps:$4 sm:$0xff]   ;;  %v89_v60 = vsub.s32 0, %v88_v59  ;;  %v85_v61 = vld [vmem:[%s3698_s5] sm:$0x1f]  ;;  %v93_v62 = vsub.s32 1, %v88_v59 }
  0x3b   :  { %748 = vmatprep.subr.bf16.mxu0 %v2837_v16 }
  0x3c   :  { %v3027_v63 = vrot.slane %v85_v61, %v89_v60  ;;  %v3029_v1 = vrot.slane %v85_v61, %v93_v62 }
  0x41   :  { %2072 = vmatmul.mubr.msk.bf16.vlgmr.msra.gmra.mrb[8].mxu1 %vm184_vm0, %v2392_v5  ;;  %2203 = vmatmul.mubr.msk.bf16.vlgmr.msra.gmra.mrb[8].mxu0 %vm184_vm0, %v2398_v14 }
  0x42   :  { %708 = vmatpush1.bf16.msra.mxu1 %v2845_v17  ;;  %749 = vmatpush1.bf16.msra.mxu0 %v2847_v18 }
  0x43   :  { %709 = vmatprep.subr.bf16.mxu1 %v2849_v19  ;;  %750 = vmatprep.subr.bf16.mxu0 %v2851_v20 }
  0x44   :  { %312 = vmatprep.mubr.bf16.mxu1 %v3702_v0  ;;  %2206 = vmatprep.mubr.msk.bf16.mxu0 %vm184_vm0, %v2819_v6 }
  0x46   :  { %710 = vmatpush1.bf16.msra.mxu1 %v2855_v21  ;;  %751 = vmatpush1.bf16.msra.mxu0 %v2857_v22 }
  0x47   :  { %711 = vmatprep.subr.bf16.mxu1 %v2861_v23  ;;  %752 = vmatprep.subr.bf16.mxu0 %v2865_v24 }
  0x49   :  { %2073 = vmatmul.mubr.msk.bf16.gmra.mrb[12].mxu1 %vm184_vm0, %v2398_v14  ;;  %2207 = vmatmul.mubr.msk.bf16.gmra.mrb[12].mxu0 %vm184_vm0, %v2834_v15 }
  0x4a   :  { %712 = vmatpush1.bf16.msra.mxu1 %v2870_v25  ;;  %753 = vmatpush1.bf16.msra.mxu0 %v2874_v26 }
  0x4b   :  { %713 = vmatprep.subr.bf16.mxu1 %v2878_v27  ;;  %754 = vmatprep.subr.bf16.mxu0 %v2880_v28 }
  0x4c   :  { %322 = vmatprep.mubr.bf16.mxu1 %v3702_v0  ;;  %780 = vmatprep.mubr.bf16.mxu0 %v3702_v0 }
  0x4e   :  { %714 = vmatpush1.bf16.msra.mxu1 %v2882_v29  ;;  %755 = vmatpush1.bf16.msra.mxu0 %v2885_v30 }
  0x4f   :  { %715 = vmatprep.subr.bf16.mxu1 %v2891_v31  ;;  %756 = vmatprep.subr.bf16.mxu0 %v2895_v32 }
  0x51   :  { %2074 = vmatmul.mubr.msk.bf16.gmra.mrb[16].mxu1 %vm184_vm0, %v2819_v6 }
  0x52   :  { %716 = vmatpush1.bf16.msra.mxu1 %v2898_v33  ;;  %757 = vmatpush1.bf16.msra.mxu0 %v2901_v34 }
  0x53   :  { %717 = vmatprep.subr.bf16.mxu1 %v2905_v35  ;;  %758 = vmatprep.subr.bf16.mxu0 %v2909_v36 }
  0x54   :  { %332 = vmatprep.mubr.bf16.mxu1 %v3702_v0 }
  0x56   :  { %718 = vmatpush1.bf16.msra.mxu1 %v2915_v37  ;;  %759 = vmatpush1.bf16.msra.mxu0 %v2917_v38 }
  0x57   :  { %719 = vmatprep.subr.bf16.mxu1 %v2921_v39  ;;  %760 = vmatprep.subr.bf16.mxu0 %v2923_v40 }
  0x59   :  { %2075 = vmatmul.mubr.msk.bf16.gmra.mrb[20].mxu1 %vm184_vm0, %v2834_v15 }
  0x5a   :  { %720 = vmatpush1.bf16.msra.mxu1 %v2928_v41  ;;  %761 = vmatpush1.bf16.msra.mxu0 %v2930_v42 }
  0x5b   :  { %721 = vmatprep.subr.bf16.mxu1 %v2934_v43  ;;  %762 = vmatprep.subr.bf16.mxu0 %v2936_v44 }
  0x5c   :  { %739 = vmatprep.mubr.bf16.mxu1 %v3702_v0 }
  0x5e   :  { %722 = vmatpush1.bf16.msra.mxu1 %v2942_v45  ;;  %763 = vmatpush1.bf16.msra.mxu0 %v2944_v46 }
  0x5f   :  { %2210 = vmatprep.subr.bf16.mxu1 %v3704_v50  ;;  %869 = vmatprep.subr.bf16.mxu0 %v2826_v13 }
  0x61   :  { %781 = vmatmul.mubr.bf16.vlgmr.msra.gmra.mrb[16].mxu0 %v498_v48  ;;  %740 = vmatmul.mubr.bf16.vlgmr.msra.gmra.mrb[24].mxu1 %v498_v48 }
  0x62   :  { %2211 = vmatpush3.bf16.msra.mxu1 %v2954_v49  ;;  %2226 = vmatprep.mubr.msk.bf16.mxu1 %vm2736_vm1, %v3704_v50 }
  0x63   :  { %2212 = vmatprep.subr.bf16.mxu1 %v3704_v50  ;;  %870 = vmatpush1.bf16.msra.mxu0 %v2845_v17 }
  0x64   :  { %871 = vmatprep.subr.bf16.mxu0 %v2849_v19  ;;  %901 = vmatprep.mubr.bf16.mxu0 %v3702_v0 }
  0x66   :  { %2213 = vmatpush3.bf16.msra.mxu1 %v2959_v51 }
  0x67   :  { %2214 = vmatprep.subr.bf16.mxu1 %v3704_v50  ;;  %872 = vmatpush1.bf16.msra.mxu0 %v2855_v21 }
  0x68   :  { %873 = vmatprep.subr.bf16.mxu0 %v2861_v23 }
  0x6a   :  { %2215 = vmatpush3.bf16.msra.mxu1 %v2968_v52 }
  0x6b   :  { %2216 = vmatprep.subr.bf16.mxu1 %v3704_v50  ;;  %874 = vmatpush1.bf16.msra.mxu0 %v2870_v25 }
  0x6c   :  { %875 = vmatprep.subr.bf16.mxu0 %v2878_v27 }
  0x6e   :  { %2217 = vmatpush3.bf16.msra.mxu1 %v2974_v53 }
  0x6f   :  { %2218 = vmatprep.subr.bf16.mxu1 %v3704_v50  ;;  %876 = vmatpush1.bf16.msra.mxu0 %v2882_v29 }
  0x70   :  { %877 = vmatprep.subr.bf16.mxu0 %v2891_v31 }
  0x72   :  { %2219 = vmatpush3.bf16.msra.mxu1 %v2980_v54 }
  0x73   :  { %2220 = vmatprep.subr.bf16.mxu1 %v3704_v50  ;;  %878 = vmatpush1.bf16.msra.mxu0 %v2898_v33 }
  0x74   :  { %879 = vmatprep.subr.bf16.mxu0 %v2905_v35 }
  0x76   :  { %2221 = vmatpush3.bf16.msra.mxu1 %v2986_v55 }
  0x77   :  { %2222 = vmatprep.subr.bf16.mxu1 %v3704_v50  ;;  %880 = vmatpush1.bf16.msra.mxu0 %v2915_v37 }
  0x78   :  { %881 = vmatprep.subr.bf16.mxu0 %v2921_v39 }
  0x7a   :  { %2223 = vmatpush3.bf16.msra.mxu1 %v2992_v56 }
  0x7b   :  { %2224 = vmatprep.subr.bf16.mxu1 %v3704_v50  ;;  %882 = vmatpush1.bf16.msra.mxu0 %v2928_v41 }
  0x7c   :  { %883 = vmatprep.subr.bf16.mxu0 %v2934_v43 }
  0x7e   :  { %2225 = vmatpush3.bf16.msra.mxu1 %v2998_v57 }
  0x7f   :  { %910 = vmatprep.subr.bf16.mxu1 %v2837_v16  ;;  %884 = vmatpush1.bf16.msra.mxu0 %v2942_v45 }
  0x80   :  { %2230 = vmatprep.subr.bf16.mxu0 %v3704_v50 }
  0x81   :  { %2227 = vmatmul.mubr.bf16.vlgmr.msra.gmra.mrb[28].mxu1 %v498_v48 }
  0x82   :  { %911 = vmatpush1.bf16.msra.mxu1 %v2847_v18  ;;  %942 = vmatprep.mubr.bf16.mxu1 %v3702_v0 }
  0x83   :  { %912 = vmatprep.subr.bf16.mxu1 %v2851_v20 }
  0x86   :  { %913 = vmatpush1.bf16.msra.mxu1 %v2857_v22 }
  0x87   :  { %914 = vmatprep.subr.bf16.mxu1 %v2865_v24 }
  0x8a   :  { %915 = vmatpush1.bf16.msra.mxu1 %v2874_v26 }
  0x8b   :  { %916 = vmatprep.subr.bf16.mxu1 %v2880_v28 }
  0x8e   :  { %917 = vmatpush1.bf16.msra.mxu1 %v2885_v30 }
  0x8f   :  { %918 = vmatprep.subr.bf16.mxu1 %v2895_v32 }
  0x92   :  { %919 = vmatpush1.bf16.msra.mxu1 %v2901_v34 }
  0x93   :  { %920 = vmatprep.subr.bf16.mxu1 %v2909_v36 }
  0x96   :  { %921 = vmatpush1.bf16.msra.mxu1 %v2917_v38 }
  0x97   :  { %922 = vmatprep.subr.bf16.mxu1 %v2923_v40 }
  0x9a   :  { %923 = vmatpush1.bf16.msra.mxu1 %v2930_v42 }
  0x9b   :  { %924 = vmatprep.subr.bf16.mxu1 %v2936_v44 }
  0x9e   :  { %925 = vmatpush1.bf16.msra.mxu1 %v2944_v46 }
  0x9f   :  { %1031 = vmatprep.subr.bf16.mxu1 %v2826_v13 }
 0x104   :  { %v251_v2 = vpop.f32.mrb[0].mxu1  ;;  %v3031_v3 = vpop.f32.mrb[0].mxu0 }
 0x105   :  { %v3034_v4 = vadd.f32 %v251_v2, %v3027_v63  ;;  %v253_v5 = vpop.f32.mrb[1].mxu1  ;;  %v3036_v6 = vpop.f32.mrb[1].mxu0 }
 0x106   :  { %v3039_v7 = vadd.f32 %v253_v5, %v3029_v1  ;;  %v255_v8 = vpop.f32.mrb[2].mxu1  ;;  %v235_v9 = vpop.f32.mrb[2].mxu0 }
 0x107   :  { %3722 = vst [vmem:[#allocation22_spill] sm:$0xff] %v3034_v4  ;;  %v3042_v10 = vadd.f32 %v255_v8, %v3027_v63  ;;  %v257_v11 = vpop.f32.mrb[3].mxu1  ;;  %v3045_v12 = vadd.f32 %v235_v9, %v3027_v63  ;;  %v237_v14 = vpop.f32.mrb[3].mxu0  ;;  %v105_v8 = vsub.s32 4, %v88_v59 }
 0x108   :  { %3723 = vst [vmem:[#allocation23_spill] sm:$0xff] %v3039_v7  ;;  %v3048_v15 = vadd.f32 %v257_v11, %v3029_v1  ;;  %v3051_v47 = vadd.f32 %v237_v14, %v3029_v1 }
 0x109   :  { %3724 = vst [vmem:[#allocation24_spill] sm:$0xff] %v3042_v10  ;;  %3725 = vst [vmem:[#allocation25_spill] sm:$0xff] %v3045_v12 }
 0x10a   :  { %3726 = vst [vmem:[#allocation26_spill] sm:$0xff] %v3048_v15  ;;  %3727 = vst [vmem:[#allocation27_spill] sm:$0xff] %v3051_v47 }
 0x10c   :  { %v261_v48 = vpop.f32.mrb[4].mxu1  ;;  %v241_v58 = vpop.f32.mrb[4].mxu0 }
 0x10d   :  { %v3054_v60 = vadd.f32 %v261_v48, %v3027_v63  ;;  %v263_v62 = vpop.f32.mrb[5].mxu1  ;;  %v3057_v2 = vadd.f32 %v241_v58, %v3027_v63  ;;  %v243_v5 = vpop.f32.mrb[5].mxu0 }
 0x10e   :  { %v3060_v9 = vadd.f32 %v263_v62, %v3029_v1  ;;  %v265_v0 = vpop.f32.mrb[6].mxu1  ;;  %v3063_v11 = vadd.f32 %v243_v5, %v3029_v1  ;;  %v245_v14 = vpop.f32.mrb[6].mxu0  ;;  %v97_v62 = vsub.s32 2, %v88_v59  ;;  %v101_v5 = vsub.s32 3, %v88_v59 }
 0x10f   :  { %3728 = vst [vmem:[#allocation28_spill] sm:$0xff] %v3054_v60  ;;  %3729 = vst [vmem:[#allocation29_spill] sm:$0xff] %v3057_v2  ;;  %v3066_v50 = vadd.f32 %v265_v0, %v3027_v63  ;;  %v267_v15 = vpop.f32.mrb[7].mxu1  ;;  %v3069_v48 = vadd.f32 %v245_v14, %v3027_v63  ;;  %v247_v60 = vpop.f32.mrb[7].mxu0 }
 0x110   :  { %3730 = vst [vmem:[#allocation30_spill] sm:$0xff] %v3060_v9  ;;  %3731 = vst [vmem:[#allocation31_spill] sm:$0xff] %v3063_v11  ;;  %v3072_v58 = vadd.f32 %v267_v15, %v3029_v1  ;;  %v3075_v10 = vadd.f32 %v247_v60, %v3029_v1  ;;  %v3077_v9 = vrot.slane %v85_v61, %v105_v8 }
 0x111   :  { %3732 = vst [vmem:[#allocation32_spill] sm:$0xff] %v3066_v50  ;;  %3733 = vst [vmem:[#allocation33_spill] sm:$0xff] %v3069_v48  ;;  %v98_v11 = vrot.slane %v85_v61, %v97_v62  ;;  %v102_v48 = vrot.slane %v85_v61, %v101_v5 }
 0x112   :  { %3734 = vst [vmem:[#allocation34_spill] sm:$0xff] %v3072_v58  ;;  %3735 = vst [vmem:[#allocation35_spill] sm:$0xff] %v3075_v10 }
 0x114   :  { %v304_v7 = vpop.f32.mrb[8].mxu1  ;;  %v2204_v4 = vpop.f32.mrb[8].mxu0 }
 0x115   :  { %v306_v0 = vpop.f32.mrb[9].mxu1  ;;  %v3080_v50 = vadd.f32 %v2204_v4, %v3077_v9  ;;  %v3082_v14 = vpop.f32.mrb[9].mxu0 }
 0x116   :  { %v308_v2 = vpop.f32.mrb[10].mxu1  ;;  %v2205_v15 = vpop.f32.mrb[10].mxu0 }
 0x117   :  { %3736 = vst [vmem:[#allocation36_spill] sm:$0xff] %v3080_v50  ;;  %v3084_v58 = vadd.f32 %v308_v2, %v98_v11  ;;  %v310_v60 = vpop.f32.mrb[11].mxu1  ;;  %v3087_v10 = vadd.f32 %v2205_v15, %v3077_v9  ;;  %v380_v8 = vpop.f32.mrb[11].mxu0 }
 0x118   :  { %v3089_v59 = vadd.f32 %v310_v60, %v102_v48  ;;  %v3092_v62 = vadd.f32 %v380_v8, %v3077_v9 }
 0x119   :  { %3737 = vst [vmem:[#allocation37_spill] sm:$0xff] %v3084_v58  ;;  %3738 = vst [vmem:[#allocation38_spill] sm:$0xff] %v3087_v10 }
 0x11a   :  { %3739 = vst [vmem:[#allocation39_spill] sm:$0xff] %v3089_v59  ;;  %3740 = vst [vmem:[#allocation40_spill] sm:$0xff] %v3092_v62 }
 0x11c   :  { %v314_v47 = vpop.f32.mrb[12].mxu1  ;;  %v2208_v4 = vpop.f32.mrb[12].mxu0 }
 0x11d   :  { %v3094_v50 = vadd.f32 %v314_v47, %v98_v11  ;;  %v316_v12 = vpop.f32.mrb[13].mxu1  ;;  %v3097_v61 = vadd.f32 %v2208_v4, %v3077_v9  ;;  %v393_v2 = vpop.f32.mrb[13].mxu0 }
 0x11e   :  { %v3099_v5 = vadd.f32 %v316_v12, %v102_v48  ;;  %v318_v58 = vpop.f32.mrb[14].mxu1  ;;  %v3102_v15 = vadd.f32 %v393_v2, %v3077_v9  ;;  %v2209_v60 = vpop.f32.mrb[14].mxu0 }
 0x11f   :  { %3741 = vst [vmem:[#allocation41_spill] sm:$0xff] %v3094_v50  ;;  %3742 = vst [vmem:[#allocation42_spill] sm:$0xff] %v3097_v61  ;;  %v3104_v10 = vadd.f32 %v318_v58, %v98_v11  ;;  %v320_v8 = vpop.f32.mrb[15].mxu1  ;;  %v3107_v62 = vadd.f32 %v2209_v60, %v3077_v9  ;;  %v396_v47 = vpop.f32.mrb[15].mxu0 }
 0x120   :  { %3743 = vst [vmem:[#allocation43_spill] sm:$0xff] %v3099_v5  ;;  %3744 = vst [vmem:[#allocation44_spill] sm:$0xff] %v3102_v15  ;;  %v3109_v50 = vadd.f32 %v320_v8, %v102_v48  ;;  %v3112_v4 = vadd.f32 %v396_v47, %v3077_v9 }
 0x121   :  { %3745 = vst [vmem:[#allocation45_spill] sm:$0xff] %v3104_v10  ;;  %3746 = vst [vmem:[#allocation46_spill] sm:$0xff] %v3107_v62 }
 0x122   :  { %3747 = vst [vmem:[#allocation47_spill] sm:$0xff] %v3109_v50  ;;  %3748 = vst [vmem:[#allocation48_spill] sm:$0xff] %v3112_v4 }
 0x124   :  { %v324_v61 = vpop.f32.mrb[16].mxu1 }
 0x125   :  { %v3114_v12 = vadd.f32 %v324_v61, %v98_v11  ;;  %v326_v5 = vpop.f32.mrb[17].mxu1 }
 0x126   :  { %v3116_v59 = vadd.f32 %v326_v5, %v102_v48  ;;  %v328_v2 = vpop.f32.mrb[18].mxu1  ;;  %v232_v5 = vadd.f32 %v3031_v3, %v3027_v63 }
 0x127   :  { %3749 = vst [vmem:[#allocation49_spill] sm:$0xff] %v3114_v12  ;;  %v3118_v15 = vadd.f32 %v328_v2, %v98_v11  ;;  %v330_v58 = vpop.f32.mrb[19].mxu1  ;;  %v305_v2 = vadd.f32 %v304_v7, %v98_v11 }
 0x128   :  { %3750 = vst [vmem:[#allocation50_spill] sm:$0xff] %v3116_v59  ;;  %v3120_v10 = vadd.f32 %v330_v58, %v102_v48  ;;  %v234_v58 = vadd.f32 %v3036_v6, %v3029_v1 }
 0x129   :  { %3751 = vst [vmem:[#allocation51_spill] sm:$0xff] %v3118_v15 }
 0x12a   :  { %3752 = vst [vmem:[#allocation52_spill] sm:$0xff] %v3120_v10  ;;  %v307_v10 = vadd.f32 %v306_v0, %v102_v48 }
 0x12c   :  { %v334_v60 = vpop.f32.mrb[20].mxu1 }
 0x12d   :  { %v3122_v62 = vadd.f32 %v334_v60, %v98_v11  ;;  %v336_v8 = vpop.f32.mrb[21].mxu1 }
 0x12e   :  { %v3124_v50 = vadd.f32 %v336_v8, %v102_v48  ;;  %v338_v47 = vpop.f32.mrb[22].mxu1 }
 0x12f   :  { %3753 = vst [vmem:[#allocation53_spill] sm:$0xff] %v3122_v62  ;;  %v3126_v4 = vadd.f32 %v338_v47, %v98_v11  ;;  %v340_v61 = vpop.f32.mrb[23].mxu1 }
 0x130   :  { %3754 = vst [vmem:[#allocation54_spill] sm:$0xff] %v3124_v50  ;;  %v3128_v12 = vadd.f32 %v340_v61, %v102_v48 }
 0x131   :  { %3755 = vst [vmem:[#allocation55_spill] sm:$0xff] %v3126_v4 }
 0x132   :  { %3756 = vst [vmem:[#allocation56_spill] sm:$0xff] %v3128_v12 }
 0x134   :  { %v782_v15 = vpop.f32.mrb[16].mxu0  ;;  %v741_v60 = vpop.f32.mrb[24].mxu1 }
 0x135   :  { %v836_v62 = vadd.f32 %v782_v15, %v305_v2  ;;  %v834_v59 = vadd.f32 %v741_v60, %v232_v5  ;;  %v784_v8 = vpop.f32.mrb[17].mxu0  ;;  %v743_v50 = vpop.f32.mrb[25].mxu1 }
 0x136   :  { %v837_v13 = vadd.f32 %v784_v8, %v307_v10  ;;  %v835_v47 = vadd.f32 %v743_v50, %v234_v58  ;;  %v745_v4 = vpop.f32.mrb[26].mxu1  ;;  %v786_v46 = vpop.f32.mrb[18].mxu0  ;;  %v63_v50 = vld [vmem:[%s3695_s2] sm:$0xff]  ;;  %s2737_s2 = smov [#allocation11]  }
 0x137   :  { %v850_v61 = vmul.f32 0.5, %v834_v59  ;;  %v746_v12 = vpop.f32.mrb[27].mxu1  ;;  %v787_v44 = vpop.f32.mrb[19].mxu0  ;;  %s2027_s18 = sshll.u32 %s2737_s2, 4  ;;  %s2028_s18 = int_to_ptr.vmem [resolvable:$true] %s2027_s18 }
 0x138   :  { %v854_v42 = vmul.f32 0.5, %v835_v47  ;;  %v859_v63 = vmul.f32 0.5, %v837_v13  ;;  %v378_v13 = vadd.f32 %v3082_v14, %v3077_v9  ;;  %v3758_v47 = vmov 0.0   ;;  %v3760_v14 = vld [vmem:[#allocation19_spill] sm:$0xff]  ;;  %s2656_s19 = scalar_lea.vmem %s2028_s18, 128  ;;  %p2661_p3 = scmp.lt.s32.totalorder %s2028_s18, %s2028_s18 }
 0x139   :  { %2460 = vtanh.f32 %v850_v61  ;;  %v3759_v9 = vmov 0   ;;  %v3761_v61 = vld [vmem:[#allocation20_spill] sm:$0xff]  ;;  %p2657_p2 = scmp.ne.s32.totalorder %s2028_s18, %s2656_s19  ;;  %p2662_p4 = scmp.lt.s32.totalorder %s2656_s19, %s2656_s19 }
 0x13a   :  { %2462 = vtanh.f32 %v854_v42 }
 0x13b   :  { %2464 = vtanh.f32 %v836_v62  ;;  %p2663_p5 = por %p2662_p4, %p2661_p3 }
 0x13c   :  { %2466 = vtanh.f32 %v859_v63  ;;  %v3762_v63 = vld [vmem:[#allocation21_spill] sm:$0xff] }
 0x13d   :  { %p2664_p6 = pnand %p2663_p5, %p2657_p2 }
 0x143   :  { %v2461_v1 = vpop.eup %2460 }
 0x144   :  { %v852_v3 = vadd.f32 1.0, %v2461_v1  ;;  %v2463_v6 = vpop.eup %2462  ;;  %v3763_v1 = vld [vmem:[#allocation18_spill] sm:$0xff] }
 0x145   :  { %v856_v11 = vadd.f32 1.0, %v2463_v6  ;;  %v2465_v48 = vpop.eup %2464 }
 0x146   :  { %v853_v7 = vmul.f32 0.5, %v852_v3  ;;  %v2467_v42 = vpop.eup %2466 }
 0x147   :  { %v857_v10 = vmul.f32 0.5, %v856_v11  ;;  %v861_v59 = vadd.f32 1.0, %v2467_v42 }
 0x148   :  { %v864_v46 = vmul.f32 %v2465_v48, %v853_v7  ;;  %v3764_v7 = vld [vmem:[#allocation25_spill] sm:$0xff] }
 0x149   :  { %v863_v0 = vmul.f32 %v857_v10, %v63_v50  ;;  %v862_v5 = vmul.f32 0.5, %v861_v59  ;;  %v3765_v48 = vld [vmem:[#allocation37_spill] sm:$0xff] }
 0x14b   :  { %v3137_v44 = vadd.f32 %v864_v46, %v863_v0  ;;  %v3766_v0 = vld [vmem:[#allocation27_spill] sm:$0xff] }
 0x14d   :  { %2468 = vtanh.f32 %v3137_v44 }
 0x154   :  { %v823_v62 = vpop.f32.mrb[28].mxu1 }
 0x155   :  { %v3142_v15 = vadd.f32 %v823_v62, %v378_v13  ;;  %v2228_v4 = vpop.f32.mrb[29].mxu1  ;;  %v3767_v13 = vld [vmem:[#allocation39_spill] sm:$0xff] }
 0x156   :  { %v826_v12 = vpop.f32.mrb[30].mxu1 }
 0x157   :  { %3757 = vst [vmem:[#allocation57_spill] sm:$0xff] %v3142_v15  ;;  %839 = vmax.xlane.f32.xlu0 %v3142_v15  ;;  %v2229_v2 = vpop.f32.mrb[31].mxu1  ;;  %v2469_v58 = vpop.eup %2468 }
 0x158   :  { %v867_v60 = vmul.f32 %v2469_v58, %v862_v5 }
 0x15a   :  { %v868_v8 = vpack.c.bf16 %v867_v60, %v867_v60 }
 0x15c   :  { %902 = vmatmul.mubr.bf16.vlgmr.msra.gmra.mrb[20].mxu0 %v868_v8  ;;  %943 = vmatmul.mubr.bf16.vlgmr.msra.gmra.mrb[32].mxu1 %v868_v8 }
 0x15d   :  { %2231 = vmatpush3.bf16.msra.mxu0 %v2954_v49  ;;  %2246 = vmatprep.mubr.msk.bf16.mxu0 %vm2736_vm1, %v3758_v47 }
 0x15e   :  { %2232 = vmatprep.subr.bf16.mxu0 %v3758_v47  ;;  %1032 = vmatpush1.bf16.msra.mxu1 %v2845_v17 }
 0x15f   :  { %1033 = vmatprep.subr.bf16.mxu1 %v2849_v19  ;;  %1063 = vmatprep.mubr.bf16.mxu1 %v3759_v9 }
 0x161   :  { %2233 = vmatpush3.bf16.msra.mxu0 %v2959_v51 }
 0x162   :  { %2234 = vmatprep.subr.bf16.mxu0 %v3758_v47  ;;  %1034 = vmatpush1.bf16.msra.mxu1 %v2855_v21 }
 0x163   :  { %1035 = vmatprep.subr.bf16.mxu1 %v2861_v23 }
 0x165   :  { %2235 = vmatpush3.bf16.msra.mxu0 %v2968_v52 }
 0x166   :  { %2236 = vmatprep.subr.bf16.mxu0 %v3758_v47  ;;  %1036 = vmatpush1.bf16.msra.mxu1 %v2870_v25 }
 0x167   :  { %1037 = vmatprep.subr.bf16.mxu1 %v2878_v27 }
 0x169   :  { %2237 = vmatpush3.bf16.msra.mxu0 %v2974_v53 }
 0x16a   :  { %2238 = vmatprep.subr.bf16.mxu0 %v3758_v47  ;;  %1038 = vmatpush1.bf16.msra.mxu1 %v2882_v29 }
 0x16b   :  { %1039 = vmatprep.subr.bf16.mxu1 %v2891_v31 }
 0x16d   :  { %2239 = vmatpush3.bf16.msra.mxu0 %v2980_v54 }
 0x16e   :  { %2240 = vmatprep.subr.bf16.mxu0 %v3758_v47  ;;  %1040 = vmatpush1.bf16.msra.mxu1 %v2898_v33 }
 0x16f   :  { %1041 = vmatprep.subr.bf16.mxu1 %v2905_v35 }
 0x171   :  { %2241 = vmatpush3.bf16.msra.mxu0 %v2986_v55 }
 0x172   :  { %2242 = vmatprep.subr.bf16.mxu0 %v3758_v47  ;;  %1042 = vmatpush1.bf16.msra.mxu1 %v2915_v37 }
 0x173   :  { %1043 = vmatprep.subr.bf16.mxu1 %v2921_v39 }
 0x175   :  { %2243 = vmatpush3.bf16.msra.mxu0 %v2992_v56 }
 0x176   :  { %2244 = vmatprep.subr.bf16.mxu0 %v3758_v47  ;;  %1044 = vmatpush1.bf16.msra.mxu1 %v2928_v41 }
 0x177   :  { %1045 = vmatprep.subr.bf16.mxu1 %v2934_v43 }
 0x179   :  { %2245 = vmatpush3.bf16.msra.mxu0 %v2998_v57 }
 0x17a   :  { %1072 = vmatprep.subr.bf16.mxu0 %v2837_v16  ;;  %1046 = vmatpush1.bf16.msra.mxu1 %v2942_v45 }
 0x17b   :  { %2250 = vmatprep.subr.bf16.mxu1 %v3758_v47 }
 0x17c   :  { %2247 = vmatmul.mubr.bf16.vlgmr.msra.gmra.mrb[24].mxu0 %v868_v8 }
 0x17d   :  { %1073 = vmatpush1.bf16.msra.mxu0 %v2847_v18  ;;  %1104 = vmatprep.mubr.bf16.mxu0 %v3759_v9 }
 0x17e   :  { %1074 = vmatprep.subr.bf16.mxu0 %v2851_v20 }
 0x181   :  { %1075 = vmatpush1.bf16.msra.mxu0 %v2857_v22 }
 0x182   :  { %1076 = vmatprep.subr.bf16.mxu0 %v2865_v24 }
 0x185   :  { %1077 = vmatpush1.bf16.msra.mxu0 %v2874_v26 }
 0x186   :  { %1078 = vmatprep.subr.bf16.mxu0 %v2880_v28 }
 0x189   :  { %1079 = vmatpush1.bf16.msra.mxu0 %v2885_v30 }
 0x18a   :  { %1080 = vmatprep.subr.bf16.mxu0 %v2895_v32 }
 0x18d   :  { %1081 = vmatpush1.bf16.msra.mxu0 %v2901_v34 }
 0x18e   :  { %1082 = vmatprep.subr.bf16.mxu0 %v2909_v36 }
 0x191   :  { %1083 = vmatpush1.bf16.msra.mxu0 %v2917_v38 }
 0x192   :  { %1084 = vmatprep.subr.bf16.mxu0 %v2923_v40 }
 0x195   :  { %1085 = vmatpush1.bf16.msra.mxu0 %v3760_v14 }
 0x196   :  { %1086 = vmatprep.subr.bf16.mxu0 %v3761_v61 }
 0x199   :  { %1087 = vmatpush1.bf16.msra.mxu0 %v3762_v63 }
 0x19a   :  { %1193 = vmatprep.subr.bf16.mxu0 %v3763_v1 }
 0x22f   :  { %v903_v3 = vpop.f32.mrb[20].mxu0  ;;  %v944_v6 = vpop.f32.mrb[32].mxu1 }
 0x230   :  { %v996_v11 = vadd.f32 %v903_v3, %v3764_v7  ;;  %v998_v50 = vadd.f32 %v944_v6, %v3765_v48  ;;  %v905_v46 = vpop.f32.mrb[21].mxu0  ;;  %v946_v10 = vpop.f32.mrb[33].mxu1 }
 0x231   :  { %v997_v42 = vadd.f32 %v905_v46, %v3766_v0  ;;  %v999_v59 = vadd.f32 %v946_v10, %v3767_v13  ;;  %v907_v62 = vpop.f32.mrb[22].mxu0  ;;  %v948_v4 = vpop.f32.mrb[34].mxu1 }
 0x232   :  { %v1012_v12 = vmul.f32 0.5, %v996_v11  ;;  %v908_v5 = vpop.f32.mrb[23].mxu0  ;;  %v949_v2 = vpop.f32.mrb[35].mxu1 }
 0x233   :  { %v1016_v58 = vmul.f32 0.5, %v997_v42  ;;  %v1021_v60 = vmul.f32 0.5, %v999_v59 }
 0x234   :  { %2470 = vtanh.f32 %v1012_v12 }
 0x235   :  { %2472 = vtanh.f32 %v1016_v58 }
 0x236   :  { %2474 = vtanh.f32 %v998_v50  ;;  %v3768_v50 = vld [vmem:[#allocation40_spill] sm:$0xff] }
 0x237   :  { %2476 = vtanh.f32 %v1021_v60 }
 0x23e   :  { %v2471_v8 = vpop.eup %2470 }
 0x23f   :  { %v2473_v3 = vpop.eup %2472  ;;  %v1014_v7 = vadd.f32 1.0, %v2471_v8 }
 0x240   :  { %v1018_v6 = vadd.f32 1.0, %v2473_v3  ;;  %v2475_v15 = vpop.eup %2474 }
 0x241   :  { %v1015_v48 = vmul.f32 0.5, %v1014_v7  ;;  %v2477_v11 = vpop.eup %2476  ;;  %v3772_v7 = vld [vmem:[#allocation31_spill] sm:$0xff] }
 0x242   :  { %v1019_v46 = vmul.f32 0.5, %v1018_v6  ;;  %v1023_v42 = vadd.f32 1.0, %v2477_v11 }
 0x243   :  { %v1026_v0 = vmul.f32 %v2475_v15, %v1015_v48  ;;  %v3773_v48 = vld [vmem:[#allocation43_spill] sm:$0xff] }
 0x244   :  { %v1025_v10 = vmul.f32 %v1019_v46, %v3137_v44  ;;  %v1024_v12 = vmul.f32 0.5, %v1023_v42 }
 0x246   :  { %v3202_v13 = vadd.f32 %v1026_v0, %v1025_v10 }
 0x248   :  { %2478 = vtanh.f32 %v3202_v13 }
 0x24f   :  { %v985_v62 = vpop.f32.mrb[24].mxu0 }
 0x250   :  { %v3206_v59 = vadd.f32 %v985_v62, %v3768_v50  ;;  %v2248_v4 = vpop.f32.mrb[25].mxu0 }
 0x251   :  { %v988_v5 = vpop.f32.mrb[26].mxu0 }
 0x252   :  { %3769 = vst [vmem:[#allocation19_spill] sm:$0xff] %v3206_v59  ;;  %v2479_v2 = vpop.eup %2478  ;;  %v2249_v58 = vpop.f32.mrb[27].mxu0  ;;  %1001 = vmax.xlane.f32.xlu0 %v3206_v59 }
 0x253   :  { %v1029_v15 = vmul.f32 %v2479_v2, %v1024_v12 }
 0x255   :  { %v1030_v60 = vpack.c.bf16 %v1029_v15, %v1029_v15 }
 0x257   :  { %1064 = vmatmul.mubr.bf16.vlgmr.msra.gmra.mrb[36].mxu1 %v1030_v60  ;;  %1105 = vmatmul.mubr.bf16.vlgmr.msra.gmra.mrb[28].mxu0 %v1030_v60 }
 0x258   :  { %2251 = vmatpush3.bf16.msra.mxu1 %v2954_v49  ;;  %2266 = vmatprep.mubr.msk.bf16.mxu1 %vm2736_vm1, %v3758_v47 }
 0x259   :  { %2252 = vmatprep.subr.bf16.mxu1 %v3758_v47  ;;  %1194 = vmatpush1.bf16.msra.mxu0 %v2845_v17 }
 0x25a   :  { %1195 = vmatprep.subr.bf16.mxu0 %v2849_v19  ;;  %1225 = vmatprep.mubr.bf16.mxu0 %v3759_v9 }
 0x25c   :  { %2253 = vmatpush3.bf16.msra.mxu1 %v2959_v51 }
 0x25d   :  { %2254 = vmatprep.subr.bf16.mxu1 %v3758_v47  ;;  %1196 = vmatpush1.bf16.msra.mxu0 %v2855_v21 }
 0x25e   :  { %1197 = vmatprep.subr.bf16.mxu0 %v2861_v23 }
 0x260   :  { %2255 = vmatpush3.bf16.msra.mxu1 %v2968_v52 }
 0x261   :  { %2256 = vmatprep.subr.bf16.mxu1 %v3758_v47  ;;  %1198 = vmatpush1.bf16.msra.mxu0 %v2870_v25 }
 0x262   :  { %1199 = vmatprep.subr.bf16.mxu0 %v2878_v27 }
 0x264   :  { %2257 = vmatpush3.bf16.msra.mxu1 %v2974_v53 }
 0x265   :  { %2258 = vmatprep.subr.bf16.mxu1 %v3758_v47  ;;  %1200 = vmatpush1.bf16.msra.mxu0 %v2882_v29 }
 0x266   :  { %1201 = vmatprep.subr.bf16.mxu0 %v2891_v31 }
 0x268   :  { %2259 = vmatpush3.bf16.msra.mxu1 %v2980_v54 }
 0x269   :  { %2260 = vmatprep.subr.bf16.mxu1 %v3758_v47  ;;  %1202 = vmatpush1.bf16.msra.mxu0 %v2898_v33 }
 0x26a   :  { %1203 = vmatprep.subr.bf16.mxu0 %v2905_v35 }
 0x26c   :  { %2261 = vmatpush3.bf16.msra.mxu1 %v2986_v55 }
 0x26d   :  { %2262 = vmatprep.subr.bf16.mxu1 %v3758_v47  ;;  %1204 = vmatpush1.bf16.msra.mxu0 %v2915_v37 }
 0x26e   :  { %1205 = vmatprep.subr.bf16.mxu0 %v2921_v39 }
 0x270   :  { %2263 = vmatpush3.bf16.msra.mxu1 %v2992_v56 }
 0x271   :  { %2264 = vmatprep.subr.bf16.mxu1 %v3758_v47  ;;  %1206 = vmatpush1.bf16.msra.mxu0 %v2928_v41 }
 0x272   :  { %1207 = vmatprep.subr.bf16.mxu0 %v2934_v43 }
 0x274   :  { %2265 = vmatpush3.bf16.msra.mxu1 %v2998_v57 }
 0x275   :  { %1234 = vmatprep.subr.bf16.mxu1 %v2837_v16  ;;  %1208 = vmatpush1.bf16.msra.mxu0 %v2942_v45 }
 0x276   :  { %2270 = vmatprep.subr.bf16.mxu0 %v3758_v47 }
 0x277   :  { %2267 = vmatmul.mubr.bf16.vlgmr.msra.gmra.mrb[40].mxu1 %v1030_v60 }
 0x278   :  { %1235 = vmatpush1.bf16.msra.mxu1 %v2847_v18  ;;  %1266 = vmatprep.mubr.bf16.mxu1 %v3759_v9 }
 0x279   :  { %1236 = vmatprep.subr.bf16.mxu1 %v2851_v20  ;;  %v3770_v20 = vld [vmem:[#allocation29_spill] sm:$0xff] }
 0x27c   :  { %1237 = vmatpush1.bf16.msra.mxu1 %v2857_v22 }
 0x27d   :  { %1238 = vmatprep.subr.bf16.mxu1 %v2865_v24  ;;  %v3771_v24 = vld [vmem:[#allocation41_spill] sm:$0xff] }
 0x280   :  { %1239 = vmatpush1.bf16.msra.mxu1 %v2874_v26 }
 0x281   :  { %1240 = vmatprep.subr.bf16.mxu1 %v2880_v28 }
 0x284   :  { %1241 = vmatpush1.bf16.msra.mxu1 %v2885_v30 }
 0x285   :  { %1242 = vmatprep.subr.bf16.mxu1 %v2895_v32 }
 0x288   :  { %1243 = vmatpush1.bf16.msra.mxu1 %v2901_v34 }
 0x289   :  { %1244 = vmatprep.subr.bf16.mxu1 %v2909_v36 }
 0x28c   :  { %1245 = vmatpush1.bf16.msra.mxu1 %v2917_v38 }
 0x28d   :  { %1246 = vmatprep.subr.bf16.mxu1 %v2923_v40 }
 0x290   :  { %1247 = vmatpush1.bf16.msra.mxu1 %v3760_v14 }
 0x291   :  { %1248 = vmatprep.subr.bf16.mxu1 %v3761_v61 }
 0x294   :  { %1249 = vmatpush1.bf16.msra.mxu1 %v3762_v63 }
 0x295   :  { %1355 = vmatprep.subr.bf16.mxu1 %v3763_v1 }
 0x32a   :  { %v1065_v16 = vpop.f32.mrb[36].mxu1  ;;  %v1106_v18 = vpop.f32.mrb[28].mxu0 }
 0x32b   :  { %v1158_v22 = vadd.f32 %v1065_v16, %v3770_v20  ;;  %v1160_v44 = vadd.f32 %v1106_v18, %v3771_v24  ;;  %v1067_v8 = vpop.f32.mrb[37].mxu1  ;;  %v1108_v3 = vpop.f32.mrb[29].mxu0 }
 0x32c   :  { %v1159_v6 = vadd.f32 %v1067_v8, %v3772_v7  ;;  %v1161_v46 = vadd.f32 %v1108_v3, %v3773_v48  ;;  %v1069_v0 = vpop.f32.mrb[38].mxu1  ;;  %v1110_v10 = vpop.f32.mrb[30].mxu0 }
 0x32d   :  { %v1174_v11 = vmul.f32 0.5, %v1158_v22  ;;  %v1070_v42 = vpop.f32.mrb[39].mxu1  ;;  %v1111_v62 = vpop.f32.mrb[31].mxu0 }
 0x32e   :  { %v1178_v50 = vmul.f32 0.5, %v1159_v6  ;;  %v1183_v1 = vmul.f32 0.5, %v1161_v46 }
 0x32f   :  { %2480 = vtanh.f32 %v1174_v11 }
 0x330   :  { %2482 = vtanh.f32 %v1178_v50 }
 0x331   :  { %2484 = vtanh.f32 %v1160_v44  ;;  %v3774_v44 = vld [vmem:[#allocation36_spill] sm:$0xff] }
 0x332   :  { %2486 = vtanh.f32 %v1183_v1 }
 0x339   :  { %v2481_v4 = vpop.eup %2480 }
 0x33a   :  { %v2483_v12 = vpop.eup %2482  ;;  %v1176_v5 = vadd.f32 1.0, %v2481_v4 }
 0x33b   :  { %v1180_v2 = vadd.f32 1.0, %v2483_v12  ;;  %v2485_v15 = vpop.eup %2484 }
 0x33c   :  { %v1177_v58 = vmul.f32 0.5, %v1176_v5  ;;  %v2487_v22 = vpop.eup %2486 }
 0x33d   :  { %v1181_v60 = vmul.f32 0.5, %v1180_v2  ;;  %v1185_v24 = vadd.f32 1.0, %v2487_v22 }
 0x33e   :  { %v1188_v16 = vmul.f32 %v2485_v15, %v1177_v58 }
 0x33f   :  { %v1187_v18 = vmul.f32 %v1181_v60, %v3202_v13  ;;  %v1186_v6 = vmul.f32 0.5, %v1185_v24 }
 0x341   :  { %v3266_v20 = vadd.f32 %v1188_v16, %v1187_v18  ;;  %v3779_v16 = vld [vmem:[#allocation38_spill] sm:$0xff] }
 0x343   :  { %2488 = vtanh.f32 %v3266_v20 }
 0x34a   :  { %v1147_v8 = vpop.f32.mrb[40].mxu1 }
 0x34b   :  { %v3270_v3 = vadd.f32 %v1147_v8, %v3774_v44  ;;  %v2268_v7 = vpop.f32.mrb[41].mxu1 }
 0x34c   :  { %v1150_v48 = vpop.f32.mrb[42].mxu1 }
 0x34d   :  { %v2489_v46 = vpop.eup %2488  ;;  %1163 = vmax.xlane.f32.xlu1 %v3270_v3  ;;  %v2269_v0 = vpop.f32.mrb[43].mxu1 }
 0x34e   :  { %v1191_v10 = vmul.f32 %v2489_v46, %v1186_v6  ;;  %v3356_v46 = vld [vmem:[#allocation8 + $0x2c] ss:$20 sps:$4 sm:$0xff]   ;;  %v3365_v0 = vld [vmem:[#allocation8 + $0x54] ss:$20 sps:$4 sm:$0xff]  }
 0x350   :  { %v1192_v11 = vpack.c.bf16 %v1191_v10, %v1191_v10  ;;  %v3370_v10 = vld [vmem:[#allocation8 + $0x50] ss:$20 sps:$4 sm:$0xff]  }
 0x352   :  { %1226 = vmatmul.mubr.bf16.vlgmr.msra.gmra.mrb[32].mxu0 %v1192_v11  ;;  %1267 = vmatmul.mubr.bf16.vlgmr.msra.gmra.mrb[44].mxu1 %v1192_v11 }
 0x353   :  { %2271 = vmatpush3.bf16.msra.mxu0 %v2954_v49  ;;  %2286 = vmatprep.mubr.msk.bf16.mxu0 %vm2736_vm1, %v3758_v47 }
 0x354   :  { %2272 = vmatprep.subr.bf16.mxu0 %v3758_v47  ;;  %1356 = vmatpush1.bf16.msra.mxu1 %v2845_v17  ;;  %v3305_v17 = vld [vmem:[#allocation8 + $0xc] ss:$20 sps:$4 sm:$0xff]  }
 0x355   :  { %1357 = vmatprep.subr.bf16.mxu1 %v2849_v19  ;;  %1387 = vmatprep.mubr.bf16.mxu1 %v3759_v9  ;;  %v3310_v19 = vld [vmem:[#allocation8 + $0x8] ss:$20 sps:$4 sm:$0xff]  }
 0x357   :  { %2273 = vmatpush3.bf16.msra.mxu0 %v2959_v51 }
 0x358   :  { %2274 = vmatprep.subr.bf16.mxu0 %v3758_v47  ;;  %1358 = vmatpush1.bf16.msra.mxu1 %v2855_v21  ;;  %v3314_v21 = vld [vmem:[#allocation8 + $0x34] ss:$20 sps:$4 sm:$0xff]  }
 0x359   :  { %1359 = vmatprep.subr.bf16.mxu1 %v2861_v23  ;;  %v3317_v23 = vld [vmem:[#allocation8 + $0x30] ss:$20 sps:$4 sm:$0xff]  }
 0x35b   :  { %2275 = vmatpush3.bf16.msra.mxu0 %v2968_v52 }
 0x35c   :  { %2276 = vmatprep.subr.bf16.mxu0 %v3758_v47  ;;  %1360 = vmatpush1.bf16.msra.mxu1 %v2870_v25  ;;  %v3320_v25 = vld [vmem:[#allocation8 + $0x5c] ss:$20 sps:$4 sm:$0xff]  }
 0x35d   :  { %1361 = vmatprep.subr.bf16.mxu1 %v2878_v27 }
 0x35f   :  { %2277 = vmatpush3.bf16.msra.mxu0 %v2974_v53 }
 0x360   :  { %2278 = vmatprep.subr.bf16.mxu0 %v3758_v47  ;;  %1362 = vmatpush1.bf16.msra.mxu1 %v2882_v29  ;;  %v3775_v29 = vld [vmem:[#allocation33_spill] sm:$0xff] }
 0x361   :  { %1363 = vmatprep.subr.bf16.mxu1 %v2891_v31  ;;  %v3776_v31 = vld [vmem:[#allocation45_spill] sm:$0xff] }
 0x363   :  { %2279 = vmatpush3.bf16.msra.mxu0 %v2980_v54 }
 0x364   :  { %2280 = vmatprep.subr.bf16.mxu0 %v3758_v47  ;;  %1364 = vmatpush1.bf16.msra.mxu1 %v2898_v33 }
 0x365   :  { %1365 = vmatprep.subr.bf16.mxu1 %v2905_v35  ;;  %v3777_v35 = vld [vmem:[#allocation35_spill] sm:$0xff] }
 0x367   :  { %2281 = vmatpush3.bf16.msra.mxu0 %v2986_v55 }
 0x368   :  { %2282 = vmatprep.subr.bf16.mxu0 %v3758_v47  ;;  %1366 = vmatpush1.bf16.msra.mxu1 %v2915_v37  ;;  %v3778_v37 = vld [vmem:[#allocation47_spill] sm:$0xff] }
 0x369   :  { %1367 = vmatprep.subr.bf16.mxu1 %v2921_v39 }
 0x36b   :  { %2283 = vmatpush3.bf16.msra.mxu0 %v2992_v56 }
 0x36c   :  { %2284 = vmatprep.subr.bf16.mxu0 %v3758_v47  ;;  %1368 = vmatpush1.bf16.msra.mxu1 %v2928_v41 }
 0x36d   :  { %1369 = vmatprep.subr.bf16.mxu1 %v2934_v43 }
 0x36f   :  { %2285 = vmatpush3.bf16.msra.mxu0 %v2998_v57 }
 0x370   :  { %1396 = vmatprep.subr.bf16.mxu0 %v3305_v17  ;;  %1370 = vmatpush1.bf16.msra.mxu1 %v2942_v45 }
 0x371   :  { %2290 = vmatprep.subr.bf16.mxu1 %v3758_v47 }
 0x372   :  { %2287 = vmatmul.mubr.bf16.vlgmr.msra.gmra.mrb[36].mxu0 %v1192_v11  ;;  %v3373_v11 = vld [vmem:[#allocation8 + $0x7c] ss:$20 sps:$4 sm:$0xff]  }
 0x373   :  { %1397 = vmatpush1.bf16.msra.mxu0 %v3310_v19  ;;  %1428 = vmatprep.mubr.bf16.mxu0 %v3759_v9 }
 0x374   :  { %1398 = vmatprep.subr.bf16.mxu0 %v3314_v21 }
 0x377   :  { %1399 = vmatpush1.bf16.msra.mxu0 %v3317_v23 }
 0x378   :  { %1400 = vmatprep.subr.bf16.mxu0 %v3320_v25 }
 0x37b   :  { %1401 = vmatpush1.bf16.msra.mxu0 %v2874_v26  ;;  %v3334_v26 = vld [vmem:[#allocation8 + $0x4] ss:$20 sps:$4 sm:$0xff]  }
 0x37c   :  { %1402 = vmatprep.subr.bf16.mxu0 %v2880_v28 }
 0x37f   :  { %1403 = vmatpush1.bf16.msra.mxu0 %v2885_v30 }
 0x380   :  { %1404 = vmatprep.subr.bf16.mxu0 %v2895_v32 }
 0x383   :  { %1405 = vmatpush1.bf16.msra.mxu0 %v2901_v34 }
 0x384   :  { %1406 = vmatprep.subr.bf16.mxu0 %v2909_v36 }
 0x387   :  { %1407 = vmatpush1.bf16.msra.mxu0 %v2917_v38 }
 0x388   :  { %1408 = vmatprep.subr.bf16.mxu0 %v2923_v40 }
 0x38b   :  { %1409 = vmatpush1.bf16.msra.mxu0 %v3760_v14 }
 0x38c   :  { %1410 = vmatprep.subr.bf16.mxu0 %v3761_v61 }
 0x38f   :  { %1411 = vmatpush1.bf16.msra.mxu0 %v3762_v63 }
 0x390   :  { %1517 = vmatprep.subr.bf16.mxu0 %v3334_v26 }
 0x425   :  { %v1227_v27 = vpop.f32.mrb[32].mxu0  ;;  %v1268_v28 = vpop.f32.mrb[44].mxu1 }
 0x426   :  { %v1320_v30 = vadd.f32 %v1227_v27, %v3775_v29  ;;  %v1322_v32 = vadd.f32 %v1268_v28, %v3776_v31  ;;  %v1229_v33 = vpop.f32.mrb[33].mxu0  ;;  %v1270_v34 = vpop.f32.mrb[45].mxu1  ;;  %v3381_v27 = vld [vmem:[#allocation8 + $0xa4] ss:$20 sps:$4 sm:$0xff]   ;;  %v3389_v28 = vld [vmem:[#allocation8 + $0xcc] ss:$20 sps:$4 sm:$0xff]  }
 0x427   :  { %v1321_v36 = vadd.f32 %v1229_v33, %v3777_v35  ;;  %v1323_v38 = vadd.f32 %v1270_v34, %v3778_v37  ;;  %v1231_v39 = vpop.f32.mrb[34].mxu0  ;;  %v1272_v40 = vpop.f32.mrb[46].mxu1  ;;  %v3397_v29 = vld [vmem:[#allocation8 + $0xf4] ss:$20 sps:$4 sm:$0xff]   ;;  %v3437_v35 = vld [vmem:[#allocation8 + $0xd0] ss:$20 sps:$4 sm:$0xff]  }
 0x428   :  { %v1336_v41 = vmul.f32 0.5, %v1320_v30  ;;  %v1232_v43 = vpop.f32.mrb[35].mxu0  ;;  %v1273_v45 = vpop.f32.mrb[47].mxu1  ;;  %v3405_v30 = vld [vmem:[#allocation8 + $0x11c] ss:$20 sps:$4 sm:$0xff]  }
 0x429   :  { %v1340_v14 = vmul.f32 0.5, %v1321_v36  ;;  %v1345_v61 = vmul.f32 0.5, %v1323_v38  ;;  %v3425_v31 = vld [vmem:[#allocation8 + $0x80] ss:$20 sps:$4 sm:$0xff]   ;;  %v3431_v33 = vld [vmem:[#allocation8 + $0xa8] ss:$20 sps:$4 sm:$0xff]  }
 0x42a   :  { %2490 = vtanh.f32 %v1336_v41  ;;  %v3434_v34 = vld [vmem:[#allocation8 + $0xd4] ss:$20 sps:$4 sm:$0xff]   ;;  %v3440_v36 = vld [vmem:[#allocation8 + $0xfc] ss:$20 sps:$4 sm:$0xff]   ;;  %v3443_v37 = vld [vmem:[#allocation8 + $0xf8] ss:$20 sps:$4 sm:$0xff]  }
 0x42b   :  { %2492 = vtanh.f32 %v1340_v14  ;;  %v3446_v38 = vld [vmem:[#allocation8 + $0x124] ss:$20 sps:$4 sm:$0xff]   ;;  %v3449_v39 = vld [vmem:[#allocation8 + $0x120] ss:$20 sps:$4 sm:$0xff]   ;;  %v3782_v14 = vld [vmem:[#allocation49_spill] sm:$0xff] }
 0x42c   :  { %2494 = vtanh.f32 %v1322_v32  ;;  %v3428_v32 = vld [vmem:[#allocation8 + $0xac] ss:$20 sps:$4 sm:$0xff]   ;;  %v3781_v43 = vld [vmem:[#allocation22_spill] sm:$0xff] }
 0x42d   :  { %2496 = vtanh.f32 %v1345_v61 }
 0x434   :  { %v2491_v63 = vpop.eup %2490 }
 0x435   :  { %v2493_v13 = vpop.eup %2492  ;;  %v1338_v42 = vadd.f32 1.0, %v2491_v63 }
 0x436   :  { %v1342_v62 = vadd.f32 1.0, %v2493_v13  ;;  %v2495_v1 = vpop.eup %2494 }
 0x437   :  { %v1339_v50 = vmul.f32 0.5, %v1338_v42  ;;  %v2497_v58 = vpop.eup %2496  ;;  %v3783_v42 = vld [vmem:[#allocation23_spill] sm:$0xff] }
 0x438   :  { %v1343_v4 = vmul.f32 0.5, %v1342_v62  ;;  %v1347_v15 = vadd.f32 1.0, %v2497_v58 }
 0x439   :  { %v1350_v12 = vmul.f32 %v2495_v1, %v1339_v50  ;;  %v3784_v50 = vld [vmem:[#allocation50_spill] sm:$0xff] }
 0x43a   :  { %v1349_v5 = vmul.f32 %v1343_v4, %v3266_v20  ;;  %v1348_v24 = vmul.f32 0.5, %v1347_v15  ;;  %v3353_v20 = vld [vmem:[#allocation8] ss:$20 sps:$4 sm:$0xff]  }
 0x43c   :  { %v3342_v2 = vadd.f32 %v1350_v12, %v1349_v5 }
 0x43e   :  { %2498 = vtanh.f32 %v3342_v2 }
 0x445   :  { %v1309_v60 = vpop.f32.mrb[36].mxu0 }
 0x446   :  { %v3346_v18 = vadd.f32 %v1309_v60, %v3779_v16  ;;  %v2288_v22 = vpop.f32.mrb[37].mxu0 }
 0x447   :  { %v1312_v8 = vpop.f32.mrb[38].mxu0 }
 0x448   :  { %3780 = vst [vmem:[#allocation20_spill] sm:$0xff] %v3346_v18  ;;  %v2499_v44 = vpop.eup %2498  ;;  %v2289_v7 = vpop.f32.mrb[39].mxu0  ;;  %1325 = vmax.xlane.f32.xlu1 %v3346_v18 }
 0x449   :  { %v1353_v6 = vmul.f32 %v2499_v44, %v1348_v24 }
 0x44b   :  { %v1354_v48 = vpack.c.bf16 %v1353_v6, %v1353_v6 }
 0x44d   :  { %1388 = vmatmul.mubr.bf16.vlgmr.msra.gmra.mrb[48].mxu1 %v1354_v48  ;;  %1429 = vmatmul.mubr.bf16.vlgmr.msra.gmra.mrb[40].mxu0 %v1354_v48 }
 0x44e   :  { %2291 = vmatpush3.bf16.msra.mxu1 %v2954_v49  ;;  %2306 = vmatprep.mubr.msk.bf16.mxu1 %vm2736_vm1, %v3758_v47  ;;  %v3362_v49 = vld [vmem:[#allocation8 + $0x28] ss:$20 sps:$4 sm:$0xff]  }
 0x44f   :  { %2292 = vmatprep.subr.bf16.mxu1 %v3758_v47  ;;  %1518 = vmatpush1.bf16.msra.mxu0 %v3353_v20 }
 0x450   :  { %1519 = vmatprep.subr.bf16.mxu0 %v3356_v46  ;;  %1549 = vmatprep.mubr.bf16.mxu0 %v3759_v9 }
 0x452   :  { %2293 = vmatpush3.bf16.msra.mxu1 %v2959_v51  ;;  %v3378_v51 = vld [vmem:[#allocation8 + $0x78] ss:$20 sps:$4 sm:$0xff]  }
 0x453   :  { %2294 = vmatprep.subr.bf16.mxu1 %v3758_v47  ;;  %1520 = vmatpush1.bf16.msra.mxu0 %v3362_v49 }
 0x454   :  { %1521 = vmatprep.subr.bf16.mxu0 %v3365_v0 }
 0x456   :  { %2295 = vmatpush3.bf16.msra.mxu1 %v2968_v52  ;;  %v3386_v52 = vld [vmem:[#allocation8 + $0xa0] ss:$20 sps:$4 sm:$0xff]  }
 0x457   :  { %2296 = vmatprep.subr.bf16.mxu1 %v3758_v47  ;;  %1522 = vmatpush1.bf16.msra.mxu0 %v3370_v10 }
 0x458   :  { %1523 = vmatprep.subr.bf16.mxu0 %v3373_v11 }
 0x45a   :  { %2297 = vmatpush3.bf16.msra.mxu1 %v2974_v53  ;;  %v3394_v53 = vld [vmem:[#allocation8 + $0xc8] ss:$20 sps:$4 sm:$0xff]  }
 0x45b   :  { %2298 = vmatprep.subr.bf16.mxu1 %v3758_v47  ;;  %1524 = vmatpush1.bf16.msra.mxu0 %v3378_v51 }
 0x45c   :  { %1525 = vmatprep.subr.bf16.mxu0 %v3381_v27 }
 0x45e   :  { %2299 = vmatpush3.bf16.msra.mxu1 %v2980_v54  ;;  %v3402_v54 = vld [vmem:[#allocation8 + $0xf0] ss:$20 sps:$4 sm:$0xff]  }
 0x45f   :  { %2300 = vmatprep.subr.bf16.mxu1 %v3758_v47  ;;  %1526 = vmatpush1.bf16.msra.mxu0 %v3386_v52 }
 0x460   :  { %1527 = vmatprep.subr.bf16.mxu0 %v3389_v28 }
 0x462   :  { %2301 = vmatpush3.bf16.msra.mxu1 %v2986_v55  ;;  %v3410_v55 = vld [vmem:[#allocation8 + $0x118] ss:$20 sps:$4 sm:$0xff]  }
 0x463   :  { %2302 = vmatprep.subr.bf16.mxu1 %v3758_v47  ;;  %1528 = vmatpush1.bf16.msra.mxu0 %v3394_v53 }
 0x464   :  { %1529 = vmatprep.subr.bf16.mxu0 %v3397_v29 }
 0x466   :  { %2303 = vmatpush3.bf16.msra.mxu1 %v2992_v56  ;;  %v3419_v56 = vld [vmem:[#allocation8 + $0x58] ss:$20 sps:$4 sm:$0xff]  }
 0x467   :  { %2304 = vmatprep.subr.bf16.mxu1 %v3758_v47  ;;  %1530 = vmatpush1.bf16.msra.mxu0 %v3402_v54 }
 0x468   :  { %1531 = vmatprep.subr.bf16.mxu0 %v3405_v30 }
 0x46a   :  { %2305 = vmatpush3.bf16.msra.mxu1 %v2998_v57  ;;  %v3422_v57 = vld [vmem:[#allocation8 + $0x84] ss:$20 sps:$4 sm:$0xff]  }
 0x46b   :  { %1558 = vmatprep.subr.bf16.mxu1 %v3305_v17  ;;  %1532 = vmatpush1.bf16.msra.mxu0 %v3410_v55 }
 0x46c   :  { %2310 = vmatprep.subr.bf16.mxu0 %v3758_v47 }
 0x46d   :  { %2307 = vmatmul.mubr.bf16.vlgmr.msra.gmra.mrb[52].mxu1 %v1354_v48 }
 0x46e   :  { %1559 = vmatpush1.bf16.msra.mxu1 %v3310_v19  ;;  %1590 = vmatprep.mubr.bf16.mxu1 %v3759_v9 }
 0x46f   :  { %1560 = vmatprep.subr.bf16.mxu1 %v3314_v21 }
 0x472   :  { %1561 = vmatpush1.bf16.msra.mxu1 %v3317_v23 }
 0x473   :  { %1562 = vmatprep.subr.bf16.mxu1 %v3320_v25 }
 0x476   :  { %1563 = vmatpush1.bf16.msra.mxu1 %v3419_v56 }
 0x477   :  { %1564 = vmatprep.subr.bf16.mxu1 %v3422_v57 }
 0x47a   :  { %1565 = vmatpush1.bf16.msra.mxu1 %v3425_v31 }
 0x47b   :  { %1566 = vmatprep.subr.bf16.mxu1 %v3428_v32 }
 0x47e   :  { %1567 = vmatpush1.bf16.msra.mxu1 %v3431_v33 }
 0x47f   :  { %1568 = vmatprep.subr.bf16.mxu1 %v3434_v34 }
 0x482   :  { %1569 = vmatpush1.bf16.msra.mxu1 %v3437_v35 }
 0x483   :  { %1570 = vmatprep.subr.bf16.mxu1 %v3440_v36 }
 0x486   :  { %1571 = vmatpush1.bf16.msra.mxu1 %v3443_v37 }
 0x487   :  { %1572 = vmatprep.subr.bf16.mxu1 %v3446_v38 }
 0x48a   :  { %1573 = vmatpush1.bf16.msra.mxu1 %v3449_v39 }
 0x48b   :  { %1679 = vmatprep.subr.bf16.mxu1 %v3334_v26 }
 0x520   :  { %v1389_v40 = vpop.f32.mrb[48].mxu1  ;;  %v1430_v41 = vpop.f32.mrb[40].mxu0 }
 0x521   :  { %v1482_v45 = vadd.f32 %v1389_v40, %v3781_v43  ;;  %v1484_v61 = vadd.f32 %v1430_v41, %v3782_v14  ;;  %v1391_v63 = vpop.f32.mrb[49].mxu1  ;;  %v1432_v13 = vpop.f32.mrb[41].mxu0 }
 0x522   :  { %v1483_v62 = vadd.f32 %v1391_v63, %v3783_v42  ;;  %v1485_v1 = vadd.f32 %v1432_v13, %v3784_v50  ;;  %v1393_v4 = vpop.f32.mrb[50].mxu1  ;;  %v1434_v12 = vpop.f32.mrb[42].mxu0 }
 0x523   :  { %v1498_v5 = vmul.f32 0.5, %v1482_v45  ;;  %v1394_v58 = vpop.f32.mrb[51].mxu1  ;;  %v1435_v15 = vpop.f32.mrb[43].mxu0 }
 0x524   :  { %v1502_v60 = vmul.f32 0.5, %v1483_v62  ;;  %v1507_v16 = vmul.f32 0.5, %v1485_v1  ;;  %v3474_v58 = vld [vmem:[#allocation8 + $0x38] ss:$20 sps:$4 sm:$0xff]   ;;  %v3480_v15 = vld [vmem:[#allocation8 + $0x60] ss:$20 sps:$4 sm:$0xff]  }
 0x525   :  { %2500 = vtanh.f32 %v1498_v5 }
 0x526   :  { %2502 = vtanh.f32 %v1502_v60  ;;  %v3486_v60 = vld [vmem:[#allocation8 + $0x88] ss:$20 sps:$4 sm:$0xff]  }
 0x527   :  { %2504 = vtanh.f32 %v1484_v61  ;;  %v3785_v61 = vld [vmem:[#allocation44_spill] sm:$0xff] }
 0x528   :  { %2506 = vtanh.f32 %v1507_v16  ;;  %v3492_v16 = vld [vmem:[#allocation8 + $0xb0] ss:$20 sps:$4 sm:$0xff]  }
 0x52f   :  { %v2501_v22 = vpop.eup %2500 }
 0x530   :  { %v2503_v24 = vpop.eup %2502  ;;  %v1500_v8 = vadd.f32 1.0, %v2501_v22  ;;  %v3498_v22 = vld [vmem:[#allocation8 + $0xd8] ss:$20 sps:$4 sm:$0xff]  }
 0x531   :  { %v1504_v44 = vadd.f32 1.0, %v2503_v24  ;;  %v2505_v6 = vpop.eup %2504  ;;  %v3504_v24 = vld [vmem:[#allocation8 + $0x100] ss:$20 sps:$4 sm:$0xff]  }
 0x532   :  { %v1501_v7 = vmul.f32 0.5, %v1500_v8  ;;  %v2507_v45 = vpop.eup %2506  ;;  %v3510_v8 = vld [vmem:[#allocation8 + $0x128] ss:$20 sps:$4 sm:$0xff]  }
 0x533   :  { %v1505_v48 = vmul.f32 0.5, %v1504_v44  ;;  %v1509_v14 = vadd.f32 1.0, %v2507_v45 }
 0x534   :  { %v1512_v40 = vmul.f32 %v2505_v6, %v1501_v7  ;;  %v3787_v6 = vld [vmem:[#allocation24_spill] sm:$0xff] }
 0x535   :  { %v1511_v41 = vmul.f32 %v1505_v48, %v3342_v2  ;;  %v1510_v62 = vmul.f32 0.5, %v1509_v14  ;;  %v3465_v2 = vld [vmem:[#allocation8 + $0x10] ss:$20 sps:$4 sm:$0xff]  }
 0x537   :  { %v3458_v43 = vadd.f32 %v1512_v40, %v1511_v41  ;;  %v3788_v40 = vld [vmem:[#allocation51_spill] sm:$0xff] }
 0x539   :  { %2508 = vtanh.f32 %v3458_v43 }
 0x540   :  { %v1471_v63 = vpop.f32.mrb[52].mxu1 }
 0x541   :  { %v3462_v13 = vadd.f32 %v1471_v63, %v3785_v61  ;;  %v2308_v42 = vpop.f32.mrb[53].mxu1  ;;  %v3789_v63 = vld [vmem:[#allocation26_spill] sm:$0xff] }
 0x542   :  { %v1474_v50 = vpop.f32.mrb[54].mxu1  ;;  %v3790_v42 = vld [vmem:[#allocation52_spill] sm:$0xff] }
 0x543   :  { %3786 = vst [vmem:[#allocation21_spill] sm:$0xff] %v3462_v13  ;;  %v2509_v1 = vpop.eup %2508  ;;  %1487 = vmax.xlane.f32.xlu0 %v3462_v13  ;;  %v2309_v4 = vpop.f32.mrb[55].mxu1 }
 0x544   :  { %v1515_v12 = vmul.f32 %v2509_v1, %v1510_v62 }
 0x546   :  { %v1516_v5 = vpack.c.bf16 %v1515_v12, %v1515_v12 }
 0x548   :  { %1550 = vmatmul.mubr.bf16.vlgmr.msra.gmra.mrb[44].mxu0 %v1516_v5  ;;  %1591 = vmatmul.mubr.bf16.vlgmr.msra.gmra.mrb[56].mxu1 %v1516_v5 }
 0x549   :  { %2311 = vmatpush3.bf16.msra.mxu0 %v3465_v2  ;;  %2326 = vmatprep.mubr.msk.bf16.mxu0 %vm2736_vm1, %v3758_v47 }
 0x54a   :  { %2312 = vmatprep.subr.bf16.mxu0 %v3758_v47  ;;  %1680 = vmatpush1.bf16.msra.mxu1 %v3353_v20 }
 0x54b   :  { %1681 = vmatprep.subr.bf16.mxu1 %v3356_v46  ;;  %1711 = vmatprep.mubr.bf16.mxu1 %v3759_v9 }
 0x54d   :  { %2313 = vmatpush3.bf16.msra.mxu0 %v3474_v58 }
 0x54e   :  { %2314 = vmatprep.subr.bf16.mxu0 %v3758_v47  ;;  %1682 = vmatpush1.bf16.msra.mxu1 %v3362_v49 }
 0x54f   :  { %1683 = vmatprep.subr.bf16.mxu1 %v3365_v0 }
 0x551   :  { %2315 = vmatpush3.bf16.msra.mxu0 %v3480_v15 }
 0x552   :  { %2316 = vmatprep.subr.bf16.mxu0 %v3758_v47  ;;  %1684 = vmatpush1.bf16.msra.mxu1 %v3370_v10 }
 0x553   :  { %1685 = vmatprep.subr.bf16.mxu1 %v3373_v11 }
 0x555   :  { %2317 = vmatpush3.bf16.msra.mxu0 %v3486_v60 }
 0x556   :  { %2318 = vmatprep.subr.bf16.mxu0 %v3758_v47  ;;  %1686 = vmatpush1.bf16.msra.mxu1 %v3378_v51 }
 0x557   :  { %1687 = vmatprep.subr.bf16.mxu1 %v3381_v27 }
 0x559   :  { %2319 = vmatpush3.bf16.msra.mxu0 %v3492_v16 }
 0x55a   :  { %2320 = vmatprep.subr.bf16.mxu0 %v3758_v47  ;;  %1688 = vmatpush1.bf16.msra.mxu1 %v3386_v52 }
 0x55b   :  { %1689 = vmatprep.subr.bf16.mxu1 %v3389_v28 }
 0x55d   :  { %2321 = vmatpush3.bf16.msra.mxu0 %v3498_v22 }
 0x55e   :  { %2322 = vmatprep.subr.bf16.mxu0 %v3758_v47  ;;  %1690 = vmatpush1.bf16.msra.mxu1 %v3394_v53 }
 0x55f   :  { %1691 = vmatprep.subr.bf16.mxu1 %v3397_v29 }
 0x561   :  { %2323 = vmatpush3.bf16.msra.mxu0 %v3504_v24 }
 0x562   :  { %2324 = vmatprep.subr.bf16.mxu0 %v3758_v47  ;;  %1692 = vmatpush1.bf16.msra.mxu1 %v3402_v54 }
 0x563   :  { %1693 = vmatprep.subr.bf16.mxu1 %v3405_v30 }
 0x565   :  { %2325 = vmatpush3.bf16.msra.mxu0 %v3510_v8 }
 0x566   :  { %1720 = vmatprep.subr.bf16.mxu0 %v3305_v17  ;;  %1694 = vmatpush1.bf16.msra.mxu1 %v3410_v55 }
 0x567   :  { %2330 = vmatprep.subr.bf16.mxu1 %v3758_v47 }
 0x568   :  { %2327 = vmatmul.mubr.bf16.vlgmr.msra.gmra.mrb[48].mxu0 %v1516_v5 }
 0x569   :  { %1721 = vmatpush1.bf16.msra.mxu0 %v3310_v19  ;;  %1752 = vmatprep.mubr.bf16.mxu0 %v3759_v9 }
 0x56a   :  { %1722 = vmatprep.subr.bf16.mxu0 %v3314_v21 }
 0x56d   :  { %1723 = vmatpush1.bf16.msra.mxu0 %v3317_v23 }
 0x56e   :  { %1724 = vmatprep.subr.bf16.mxu0 %v3320_v25 }
 0x571   :  { %1725 = vmatpush1.bf16.msra.mxu0 %v3419_v56 }
 0x572   :  { %1726 = vmatprep.subr.bf16.mxu0 %v3422_v57 }
 0x575   :  { %1727 = vmatpush1.bf16.msra.mxu0 %v3425_v31 }
 0x576   :  { %1728 = vmatprep.subr.bf16.mxu0 %v3428_v32 }
 0x579   :  { %1729 = vmatpush1.bf16.msra.mxu0 %v3431_v33 }
 0x57a   :  { %1730 = vmatprep.subr.bf16.mxu0 %v3434_v34 }
 0x57d   :  { %1731 = vmatpush1.bf16.msra.mxu0 %v3437_v35 }
 0x57e   :  { %1732 = vmatprep.subr.bf16.mxu0 %v3440_v36 }
 0x581   :  { %1733 = vmatpush1.bf16.msra.mxu0 %v3443_v37 }
 0x582   :  { %1734 = vmatprep.subr.bf16.mxu0 %v3446_v38 }
 0x585   :  { %1735 = vmatpush1.bf16.msra.mxu0 %v3449_v39 }
 0x586   :  { %1841 = vmatprep.subr.bf16.mxu0 %v3334_v26 }
 0x61b   :  { %v1551_v44 = vpop.f32.mrb[44].mxu0  ;;  %v1592_v7 = vpop.f32.mrb[56].mxu1 }
 0x61c   :  { %v1644_v48 = vadd.f32 %v1551_v44, %v3787_v6  ;;  %v1646_v41 = vadd.f32 %v1592_v7, %v3788_v40  ;;  %v1553_v45 = vpop.f32.mrb[45].mxu0  ;;  %v1594_v14 = vpop.f32.mrb[57].mxu1 }
 0x61d   :  { %v1645_v61 = vadd.f32 %v1553_v45, %v3789_v63  ;;  %v1647_v62 = vadd.f32 %v1594_v14, %v3790_v42  ;;  %v1555_v50 = vpop.f32.mrb[46].mxu0  ;;  %v1596_v1 = vpop.f32.mrb[58].mxu1 }
 0x61e   :  { %v1660_v4 = vmul.f32 0.5, %v1644_v48  ;;  %v1556_v12 = vpop.f32.mrb[47].mxu0  ;;  %v1597_v5 = vpop.f32.mrb[59].mxu1 }
 0x61f   :  { %v1664_v18 = vmul.f32 0.5, %v1645_v61  ;;  %v1669_v26 = vmul.f32 0.5, %v1647_v62 }
 0x620   :  { %2510 = vtanh.f32 %v1660_v4 }
 0x621   :  { %2512 = vtanh.f32 %v1664_v18 }
 0x622   :  { %2514 = vtanh.f32 %v1646_v41  ;;  %v3791_v41 = vld [vmem:[#allocation48_spill] sm:$0xff] }
 0x623   :  { %2516 = vtanh.f32 %v1669_v26 }
 0x62a   :  { %v2511_v59 = vpop.eup %2510 }
 0x62b   :  { %v2513_v44 = vpop.eup %2512  ;;  %v1662_v6 = vadd.f32 1.0, %v2511_v59 }
 0x62c   :  { %v1666_v7 = vadd.f32 1.0, %v2513_v44  ;;  %v2515_v13 = vpop.eup %2514 }
 0x62d   :  { %v1663_v40 = vmul.f32 0.5, %v1662_v6  ;;  %v2517_v48 = vpop.eup %2516 }
 0x62e   :  { %v1667_v45 = vmul.f32 0.5, %v1666_v7  ;;  %v1671_v61 = vadd.f32 1.0, %v2517_v48 }
 0x62f   :  { %v1674_v63 = vmul.f32 %v2515_v13, %v1663_v40 }
 0x630   :  { %v1673_v14 = vmul.f32 %v1667_v45, %v3458_v43  ;;  %v1672_v59 = vmul.f32 0.5, %v1671_v61 }
 0x632   :  { %v3538_v42 = vadd.f32 %v1674_v63, %v1673_v14  ;;  %v3797_v63 = vld [vmem:[#allocation21_spill] sm:$0xff] }
 0x634   :  { %2518 = vtanh.f32 %v3538_v42 }
 0x63b   :  { %v1633_v18 = vpop.f32.mrb[48].mxu0 }
 0x63c   :  { %v3542_v62 = vadd.f32 %v1633_v18, %v3791_v41  ;;  %v2328_v50 = vpop.f32.mrb[49].mxu0  ;;  %v3798_v18 = vld [vmem:[#allocation42_spill] sm:$0xff] }
 0x63d   :  { %v1636_v1 = vpop.f32.mrb[50].mxu0 }
 0x63e   :  { %v2519_v4 = vpop.eup %2518  ;;  %1649 = vmax.xlane.f32.xlu1 %v3542_v62  ;;  %v2329_v12 = vpop.f32.mrb[51].mxu0 }
 0x63f   :  { %v1677_v13 = vmul.f32 %v2519_v4, %v1672_v59 }
 0x641   :  { %v1678_v5 = vpack.c.bf16 %v1677_v13, %v1677_v13 }
 0x643   :  { %1712 = vmatmul.mubr.bf16.vlgmr.msra.gmra.mrb[60].mxu1 %v1678_v5  ;;  %1753 = vmatmul.mubr.bf16.vlgmr.msra.gmra.mrb[52].mxu0 %v1678_v5 }
 0x644   :  { %2331 = vmatpush3.bf16.msra.mxu1 %v3465_v2  ;;  %2346 = vmatprep.mubr.msk.bf16.mxu1 %vm2736_vm1, %v3758_v47 }
 0x645   :  { %2332 = vmatprep.subr.bf16.mxu1 %v3758_v47  ;;  %1842 = vmatpush1.bf16.msra.mxu0 %v3353_v20 }
 0x646   :  { %1843 = vmatprep.subr.bf16.mxu0 %v3356_v46  ;;  %1873 = vmatprep.mubr.bf16.mxu0 %v3759_v9 }
 0x648   :  { %2333 = vmatpush3.bf16.msra.mxu1 %v3474_v58 }
 0x649   :  { %2334 = vmatprep.subr.bf16.mxu1 %v3758_v47  ;;  %1844 = vmatpush1.bf16.msra.mxu0 %v3362_v49  ;;  %v3794_v49 = vld [vmem:[#allocation30_spill] sm:$0xff] }
 0x64a   :  { %1845 = vmatprep.subr.bf16.mxu0 %v3365_v0 }
 0x64c   :  { %2335 = vmatpush3.bf16.msra.mxu1 %v3480_v15 }
 0x64d   :  { %2336 = vmatprep.subr.bf16.mxu1 %v3758_v47  ;;  %1846 = vmatpush1.bf16.msra.mxu0 %v3370_v10  ;;  %v3795_v10 = vld [vmem:[#allocation54_spill] sm:$0xff] }
 0x64e   :  { %1847 = vmatprep.subr.bf16.mxu0 %v3373_v11 }
 0x650   :  { %2337 = vmatpush3.bf16.msra.mxu1 %v3486_v60 }
 0x651   :  { %2338 = vmatprep.subr.bf16.mxu1 %v3758_v47  ;;  %1848 = vmatpush1.bf16.msra.mxu0 %v3378_v51 }
 0x652   :  { %1849 = vmatprep.subr.bf16.mxu0 %v3381_v27 }
 0x654   :  { %2339 = vmatpush3.bf16.msra.mxu1 %v3492_v16 }
 0x655   :  { %2340 = vmatprep.subr.bf16.mxu1 %v3758_v47  ;;  %1850 = vmatpush1.bf16.msra.mxu0 %v3386_v52 }
 0x656   :  { %1851 = vmatprep.subr.bf16.mxu0 %v3389_v28 }
 0x658   :  { %2341 = vmatpush3.bf16.msra.mxu1 %v3498_v22 }
 0x659   :  { %2342 = vmatprep.subr.bf16.mxu1 %v3758_v47  ;;  %1852 = vmatpush1.bf16.msra.mxu0 %v3394_v53 }
 0x65a   :  { %1853 = vmatprep.subr.bf16.mxu0 %v3397_v29 }
 0x65c   :  { %2343 = vmatpush3.bf16.msra.mxu1 %v3504_v24 }
 0x65d   :  { %2344 = vmatprep.subr.bf16.mxu1 %v3758_v47  ;;  %1854 = vmatpush1.bf16.msra.mxu0 %v3402_v54 }
 0x65e   :  { %1855 = vmatprep.subr.bf16.mxu0 %v3405_v30 }
 0x660   :  { %2345 = vmatpush3.bf16.msra.mxu1 %v3510_v8 }
 0x661   :  { %1882 = vmatprep.subr.bf16.mxu1 %v3305_v17  ;;  %1856 = vmatpush1.bf16.msra.mxu0 %v3410_v55 }
 0x662   :  { %2350 = vmatprep.subr.bf16.mxu0 %v3758_v47 }
 0x663   :  { %2347 = vmatmul.mubr.bf16.vlgmr.msra.gmra.mrb[64].mxu1 %v1678_v5 }
 0x664   :  { %1883 = vmatpush1.bf16.msra.mxu1 %v3310_v19  ;;  %1914 = vmatprep.mubr.bf16.mxu1 %v3759_v9  ;;  %v3792_v19 = vld [vmem:[#allocation28_spill] sm:$0xff] }
 0x665   :  { %1884 = vmatprep.subr.bf16.mxu1 %v3314_v21 }
 0x668   :  { %1885 = vmatpush1.bf16.msra.mxu1 %v3317_v23  ;;  %v3793_v23 = vld [vmem:[#allocation53_spill] sm:$0xff] }
 0x669   :  { %1886 = vmatprep.subr.bf16.mxu1 %v3320_v25 }
 0x66c   :  { %1887 = vmatpush1.bf16.msra.mxu1 %v3419_v56 }
 0x66d   :  { %1888 = vmatprep.subr.bf16.mxu1 %v3422_v57  ;;  %v840_v57 = vpop.xlane.xlu0 %839 }
 0x670   :  { %1889 = vmatpush1.bf16.msra.mxu1 %v3425_v31 }
 0x671   :  { %1890 = vmatprep.subr.bf16.mxu1 %v3428_v32 }
 0x674   :  { %1891 = vmatpush1.bf16.msra.mxu1 %v3431_v33 }
 0x675   :  { %1892 = vmatprep.subr.bf16.mxu1 %v3434_v34 }
 0x678   :  { %1893 = vmatpush1.bf16.msra.mxu1 %v3437_v35  ;;  %v3796_v35 = vld [vmem:[#allocation57_spill] sm:$0xff] }
 0x679   :  { %1894 = vmatprep.subr.bf16.mxu1 %v3440_v36  ;;  %v3601_v36 = vsub.f32 %v3796_v35, %v840_v57 }
 0x67b   :  { %v842_v44 = vmul.f32 1.442695, %v3601_v36 }
 0x67c   :  { %1895 = vmatpush1.bf16.msra.mxu1 %v3443_v37 }
 0x67d   :  { %1896 = vmatprep.subr.bf16.mxu1 %v3446_v38  ;;  %v3603_v38 = vpop.xlane.xlu0 %1001 }
 0x680   :  { %1897 = vmatpush1.bf16.msra.mxu1 %v3449_v39  ;;  %v1164_v39 = vpop.xlane.xlu1 %1163 }
 0x681   :  { %v3610_v6 = vsub.f32 %v3270_v3, %v1164_v39  ;;  %v1488_v7 = vpop.xlane.xlu0 %1487 }
 0x682   :  { %v3615_v14 = vsub.f32 %v3797_v63, %v1488_v7 }
 0x683   :  { %v1166_v45 = vmul.f32 1.442695, %v3610_v6 }
 0x716   :  { %v1713_v9 = vpop.f32.mrb[60].mxu1  ;;  %v1754_v17 = vpop.f32.mrb[52].mxu0 }
 0x717   :  { %v1806_v21 = vadd.f32 %v1713_v9, %v3792_v19  ;;  %v1808_v25 = vadd.f32 %v1754_v17, %v3793_v23  ;;  %v1715_v20 = vpop.f32.mrb[61].mxu1  ;;  %v1756_v46 = vpop.f32.mrb[53].mxu0 }
 0x718   :  { %v1807_v0 = vadd.f32 %v1715_v20, %v3794_v49  ;;  %v1809_v11 = vadd.f32 %v1756_v46, %v3795_v10  ;;  %v1717_v51 = vpop.f32.mrb[62].mxu1  ;;  %v1758_v27 = vpop.f32.mrb[54].mxu0 }
 0x719   :  { %v1822_v52 = vmul.f32 0.5, %v1806_v21  ;;  %v1718_v28 = vpop.f32.mrb[63].mxu1  ;;  %v1759_v53 = vpop.f32.mrb[55].mxu0  ;;  %v3800_v27 = vld [vmem:[#allocation55_spill] sm:$0xff] }
 0x71a   :  { %v1826_v29 = vmul.f32 0.5, %v1807_v0  ;;  %v1831_v54 = vmul.f32 0.5, %v1809_v11  ;;  %v3799_v11 = vld [vmem:[#allocation32_spill] sm:$0xff] }
 0x71b   :  { %2520 = vtanh.f32 %v1822_v52 }
 0x71c   :  { %2522 = vtanh.f32 %v1826_v29  ;;  %v3801_v29 = vld [vmem:[#allocation34_spill] sm:$0xff] }
 0x71d   :  { %2524 = vtanh.f32 %v1808_v25 }
 0x71e   :  { %2526 = vtanh.f32 %v1831_v54 }
 0x725   :  { %v2521_v30 = vpop.eup %2520 }
 0x726   :  { %v2523_v55 = vpop.eup %2522  ;;  %v1824_v56 = vadd.f32 1.0, %v2521_v30  ;;  %v3802_v30 = vld [vmem:[#allocation56_spill] sm:$0xff] }
 0x727   :  { %v1828_v31 = vadd.f32 1.0, %v2523_v55  ;;  %v2525_v33 = vpop.eup %2524 }
 0x728   :  { %v1825_v32 = vmul.f32 0.5, %v1824_v56  ;;  %v2527_v40 = vpop.eup %2526 }
 0x729   :  { %v1829_v34 = vmul.f32 0.5, %v1828_v31  ;;  %v1833_v48 = vadd.f32 1.0, %v2527_v40  ;;  %v3803_v40 = vld [vmem:[#allocation19_spill] sm:$0xff] }
 0x72a   :  { %v1836_v37 = vmul.f32 %v2525_v33, %v1825_v32 }
 0x72b   :  { %v1835_v43 = vmul.f32 %v1829_v34, %v3538_v42  ;;  %v1490_v42 = vmul.f32 1.442695, %v3615_v14  ;;  %v1834_v3 = vmul.f32 0.5, %v1833_v48 }
 0x72d   :  { %v3606_v26 = vadd.f32 %v1836_v37, %v1835_v43 }
 0x72f   :  { %2528 = vtanh.f32 %v3606_v26 }
 0x730   :  { %2530 = vpow2.f32 %v842_v44 }
 0x731   :  { %2532 = vpow2.f32 %v1166_v45  ;;  %v1003_v45 = vsub.f32 %v3803_v40, %v3603_v38 }
 0x732   :  { %2534 = vpow2.f32 %v1490_v42 }
 0x736   :  { %v1795_v61 = vpop.f32.mrb[64].mxu1 }
 0x737   :  { %v1810_v41 = vadd.f32 %v1795_v61, %v3798_v18  ;;  %v2348_v50 = vpop.f32.mrb[65].mxu1  ;;  %v1004_v61 = vmul.f32 1.442695, %v1003_v45  ;;  %v3804_v18 = vld [vmem:[#allocation20_spill] sm:$0xff] }
 0x738   :  { %v1798_v59 = vpop.f32.mrb[66].mxu1 }
 0x739   :  { %v2529_v1 = vpop.eup %2528  ;;  %1811 = vmax.xlane.f32.xlu0 %v1810_v41  ;;  %v2349_v4 = vpop.f32.mrb[67].mxu1 }
 0x73a   :  { %v1839_v12 = vmul.f32 %v2529_v1, %v1834_v3  ;;  %v2531_v13 = vpop.eup %2530 }
 0x73b   :  { %v2533_v9 = vpop.eup %2532 }
 0x73c   :  { %v1840_v5 = vpack.c.bf16 %v1839_v12, %v1839_v12  ;;  %v2535_v17 = vpop.eup %2534 }
 0x73d   :  { %844 = vadd.xlane.f32.xlu0 %v2531_v13  ;;  %v3805_v13 = vld [vmem:[#allocation46_spill] sm:$0xff] }
 0x73e   :  { %1874 = vmatmul.mubr.bf16.vlgmr.msra.gmra.mrb[56].mxu0 %v1840_v5  ;;  %1915 = vmatmul.mubr.bf16.vlgmr.msra.gmra.mrb[68].mxu1 %v1840_v5 }
 0x73f   :  { %2351 = vmatpush3.bf16.msra.mxu0 %v3465_v2  ;;  %2366 = vmatprep.mubr.msk.bf16.mxu0 %vm2736_vm1, %v3758_v47 }
 0x740   :  { %2352 = vmatprep.subr.bf16.mxu0 %v3758_v47 }
 0x741   :  { %1168 = vadd.xlane.f32.xlu0 %v2533_v9 }
 0x743   :  { %2353 = vmatpush3.bf16.msra.mxu0 %v3474_v58 }
 0x744   :  { %2354 = vmatprep.subr.bf16.mxu0 %v3758_v47 }
 0x745   :  { %1492 = vadd.xlane.f32.xlu0 %v2535_v17 }
 0x747   :  { %2355 = vmatpush3.bf16.msra.mxu0 %v3480_v15 }
 0x748   :  { %2356 = vmatprep.subr.bf16.mxu0 %v3758_v47 }
 0x74b   :  { %2357 = vmatpush3.bf16.msra.mxu0 %v3486_v60 }
 0x74c   :  { %2358 = vmatprep.subr.bf16.mxu0 %v3758_v47 }
 0x74f   :  { %2359 = vmatpush3.bf16.msra.mxu0 %v3492_v16 }
 0x750   :  { %2360 = vmatprep.subr.bf16.mxu0 %v3758_v47 }
 0x753   :  { %2361 = vmatpush3.bf16.msra.mxu0 %v3498_v22 }
 0x754   :  { %2362 = vmatprep.subr.bf16.mxu0 %v3758_v47 }
 0x757   :  { %2363 = vmatpush3.bf16.msra.mxu0 %v3504_v24 }
 0x758   :  { %2364 = vmatprep.subr.bf16.mxu0 %v3758_v47 }
 0x75b   :  { %2365 = vmatpush3.bf16.msra.mxu0 %v3510_v8 }
 0x75e   :  { %2367 = vmatmul.mubr.bf16.vlgmr.msra.gmra.mrb[60].mxu0 %v1840_v5 }
 0x7c6   :  { %v1812_v2 = vpop.xlane.xlu0 %1811 }
 0x7c7   :  { %v3636_v58 = vsub.f32 %v1810_v41, %v1812_v2 }
 0x7c9   :  { %v1814_v15 = vmul.f32 1.442695, %v3636_v58 }
 0x7ca   :  { %v845_v60 = vpop.xlane.xlu0 %844 }
 0x7cb   :  { %2536 = vpow2.f32 %v1814_v15 }
 0x7cc   :  { %2538 = vlog2.f32 %v845_v60 }
 0x7ce   :  { %v1169_v16 = vpop.xlane.xlu0 %1168 }
 0x7cf   :  { %2540 = vlog2.f32 %v1169_v16 }
 0x7d2   :  { %v1493_v22 = vpop.xlane.xlu0 %1492 }
 0x7d3   :  { %2542 = vlog2.f32 %v1493_v22 }
 0x7d5   :  { %v2537_v19 = vpop.eup %2536 }
 0x7d6   :  { %v2539_v21 = vpop.eup %2538  ;;  %1816 = vadd.xlane.f32.xlu0 %v2537_v19 }
 0x7d7   :  { %v847_v24 = vmul.f32 0.6931472, %v2539_v21 }
 0x7d9   :  { %v2541_v47 = vpop.eup %2540  ;;  %v848_v8 = vsub.f32 %v3601_v36, %v847_v24 }
 0x7da   :  { %v1171_v23 = vmul.f32 0.6931472, %v2541_v47 }
 0x7db   :  { %849 = vst [vmem:[#allocation10] sm:$0xff] %v848_v8 }
 0x7dc   :  { %v1172_v25 = vsub.f32 %v3610_v6, %v1171_v23 }
 0x7dd   :  { %v2543_v20 = vpop.eup %2542 }
 0x7de   :  { %1173 = vst [vmem:[#allocation10 + $0x10] sm:$0xff] %v1172_v25  ;;  %v1495_v46 = vmul.f32 0.6931472, %v2543_v20 }
 0x7e0   :  { %v1496_v49 = vsub.f32 %v3615_v14, %v1495_v46  ;;  %v1326_v14 = vpop.xlane.xlu1 %1325 }
 0x7e1   :  { %v1327_v41 = vsub.f32 %v3804_v18, %v1326_v14 }
 0x7e2   :  { %1497 = vst [vmem:[#allocation10 + $0x20] sm:$0xff] %v1496_v49 }
 0x7e3   :  { %v1328_v59 = vmul.f32 1.442695, %v1327_v41 }
 0x7e4   :  { %v1650_v50 = vpop.xlane.xlu1 %1649 }
 0x7e5   :  { %v1651_v1 = vsub.f32 %v3542_v62, %v1650_v50 }
 0x7e7   :  { %v1652_v12 = vmul.f32 1.442695, %v1651_v1 }
 0x811   :  { %v1875_v0 = vpop.f32.mrb[56].mxu0  ;;  %v1916_v10 = vpop.f32.mrb[68].mxu1 }
 0x812   :  { %v1968_v51 = vadd.f32 %v1875_v0, %v3799_v11  ;;  %v1970_v52 = vadd.f32 %v1916_v10, %v3800_v27  ;;  %v1877_v28 = vpop.f32.mrb[57].mxu0  ;;  %v1918_v53 = vpop.f32.mrb[69].mxu1 }
 0x813   :  { %v1969_v54 = vadd.f32 %v1877_v28, %v3801_v29  ;;  %v1971_v55 = vadd.f32 %v1918_v53, %v3802_v30  ;;  %v1879_v56 = vpop.f32.mrb[58].mxu0  ;;  %v1920_v57 = vpop.f32.mrb[70].mxu1 }
 0x814   :  { %v1984_v31 = vmul.f32 0.5, %v1968_v51  ;;  %v1880_v32 = vpop.f32.mrb[59].mxu0  ;;  %v1921_v33 = vpop.f32.mrb[71].mxu1 }
 0x815   :  { %v1988_v34 = vmul.f32 0.5, %v1969_v54  ;;  %v1993_v35 = vmul.f32 0.5, %v1971_v55 }
 0x816   :  { %2544 = vtanh.f32 %v1984_v31 }
 0x817   :  { %2546 = vtanh.f32 %v1988_v34 }
 0x818   :  { %2548 = vtanh.f32 %v1970_v52 }
 0x819   :  { %2550 = vtanh.f32 %v1993_v35 }
 0x820   :  { %v2545_v36 = vpop.eup %2544 }
 0x821   :  { %v2547_v37 = vpop.eup %2546  ;;  %v1986_v39 = vadd.f32 1.0, %v2545_v36 }
 0x822   :  { %v1990_v43 = vadd.f32 1.0, %v2547_v37  ;;  %v2549_v6 = vpop.eup %2548 }
 0x823   :  { %v1987_v44 = vmul.f32 0.5, %v1986_v39  ;;  %v2551_v3 = vpop.eup %2550 }
 0x824   :  { %v1991_v7 = vmul.f32 0.5, %v1990_v43  ;;  %v1995_v4 = vadd.f32 1.0, %v2551_v3 }
 0x825   :  { %v1998_v63 = vmul.f32 %v2549_v6, %v1987_v44 }
 0x826   :  { %v1997_v48 = vmul.f32 %v1991_v7, %v3606_v26  ;;  %v1996_v26 = vmul.f32 0.5, %v1995_v4 }
 0x828   :  { %v1999_v42 = vadd.f32 %v1998_v63, %v1997_v48 }
 0x82a   :  { %2552 = vtanh.f32 %v1999_v42  ;;  %2008 = vst [vmem:[#allocation13] sm:$0xff] %v1999_v42 }
 0x82b   :  { %2554 = vpow2.f32 %v1004_v61 }
 0x82c   :  { %2556 = vpow2.f32 %v1328_v59 }
 0x82d   :  { %2558 = vpow2.f32 %v1652_v12 }
 0x831   :  { %v1957_v38 = vpop.f32.mrb[60].mxu0 }
 0x832   :  { %v1972_v5 = vadd.f32 %v1957_v38, %v3805_v13  ;;  %v2368_v9 = vpop.f32.mrb[61].mxu0 }
 0x833   :  { %v1960_v17 = vpop.f32.mrb[62].mxu0 }
 0x834   :  { %v2553_v2 = vpop.eup %2552  ;;  %1973 = vmax.xlane.f32.xlu1 %v1972_v5  ;;  %v2369_v15 = vpop.f32.mrb[63].mxu0 }
 0x835   :  { %v2001_v60 = vmul.f32 %v2553_v2, %v1996_v26  ;;  %v2555_v16 = vpop.eup %2554 }
 0x836   :  { %v2557_v22 = vpop.eup %2556 }
 0x837   :  { %2007 = vst [vmem:[#allocation11] sm:$0xff] %v2001_v60  ;;  %v2559_v62 = vpop.eup %2558 }
 0x838   :  { %1006 = vadd.xlane.f32.xlu1 %v2555_v16 }
 0x83c   :  { %1330 = vadd.xlane.f32.xlu1 %v2557_v22 }
 0x840   :  { %1654 = vadd.xlane.f32.xlu1 %v2559_v62 }
 0x863   :  { %v1817_v19 = vpop.xlane.xlu0 %1816 }
 0x864   :  { %2560 = vlog2.f32 %v1817_v19 }
 0x86e   :  { %v2561_v21 = vpop.eup %2560 }
 0x86f   :  { %v1819_v24 = vmul.f32 0.6931472, %v2561_v21 }
 0x871   :  { %v1820_v47 = vsub.f32 %v3636_v58, %v1819_v24 }
 0x873   :  { %1821 = vst [vmem:[#allocation10 + $0x30] sm:$0xff] %v1820_v47 }
 0x8c1   :  { %v1974_v8 = vpop.xlane.xlu1 %1973 }
 0x8c2   :  { %v3653_v23 = vsub.f32 %v1972_v5, %v1974_v8 }
 0x8c4   :  { %v1976_v25 = vmul.f32 1.442695, %v3653_v23 }
 0x8c5   :  { %v1007_v20 = vpop.xlane.xlu1 %1006 }
 0x8c6   :  { %2562 = vpow2.f32 %v1976_v25 }
 0x8c7   :  { %2564 = vlog2.f32 %v1007_v20 }
 0x8c9   :  { %v1331_v46 = vpop.xlane.xlu1 %1330 }
 0x8ca   :  { %2566 = vlog2.f32 %v1331_v46 }
 0x8cd   :  { %v1655_v49 = vpop.xlane.xlu1 %1654 }
 0x8ce   :  { %2568 = vlog2.f32 %v1655_v49 }
 0x8d0   :  { %v2563_v0 = vpop.eup %2562 }
 0x8d1   :  { %v2565_v10 = vpop.eup %2564  ;;  %1978 = vadd.xlane.f32.xlu1 %v2563_v0 }
 0x8d2   :  { %v1009_v11 = vmul.f32 0.6931472, %v2565_v10 }
 0x8d4   :  { %v2567_v51 = vpop.eup %2566  ;;  %v1010_v27 = vsub.f32 %v1003_v45, %v1009_v11 }
 0x8d5   :  { %v1333_v58 = vmul.f32 0.6931472, %v2567_v51 }
 0x8d6   :  { %1011 = vst [vmem:[#allocation10 + $0x8] sm:$0xff] %v1010_v27 }
 0x8d7   :  { %v1334_v52 = vsub.f32 %v1327_v41, %v1333_v58 }
 0x8d8   :  { %v2569_v28 = vpop.eup %2568 }
 0x8d9   :  { %1335 = vst [vmem:[#allocation10 + $0x18] sm:$0xff] %v1334_v52  ;;  %v1657_v53 = vmul.f32 0.6931472, %v2569_v28 }
 0x8db   :  { %v1658_v29 = vsub.f32 %v1651_v1, %v1657_v53 }
 0x8dd   :  { %1659 = vst [vmem:[#allocation10 + $0x28] sm:$0xff] %v1658_v29 }
 0x8de   :  { %2667 = shalt.err (!%p2664_p6)
}
 0x8df   :  { %s2668_s22 = scalar_lea.hbm %s3700_s7, 128 }
 0x8e0   :  { %p2669_p7 = scmp.ne.s32.totalorder %s3700_s7, %s2668_s22  ;;  %p2672_p8 = scmp.lt.u32.totalorder %s2668_s22, %s3700_s7 }
 0x8e2   :  { %p2674_p9 = pnand %p2672_p8, %p2669_p7 }
 0x8e4   :  { %2677 = shalt.err (!%p2674_p9)
}
 0x8e5   :  { %2030 = dma.vmem_to_hbm [thread:$0]  %s2028_s18, 128, %s3700_s7, [#allocation12]  }
 0x8e6   :  { %s2738_s3 = smov [#allocation13]  }
 0x8e7   :  { %s2037_s28 = sshll.u32 %s2738_s3, 4  ;;  %s2038_s28 = int_to_ptr.vmem [resolvable:$true] %s2037_s28 }
 0x8e8   :  { %s2678_s4 = scalar_lea.vmem %s2038_s28, 128  ;;  %p2683_p11 = scmp.lt.s32.totalorder %s2038_s28, %s2038_s28 }
 0x8e9   :  { %p2679_p10 = scmp.ne.s32.totalorder %s2038_s28, %s2678_s4  ;;  %p2684_p12 = scmp.lt.s32.totalorder %s2678_s4, %s2678_s4 }
 0x8eb   :  { %p2685_p13 = por %p2684_p12, %p2683_p11 }
 0x8ed   :  { %p2686_p0 = pnand %p2685_p13, %p2679_p10 }
 0x8ef   :  { %2689 = shalt.err (!%p2686_p0)
}
 0x8f0   :  { %s2690_s10 = scalar_lea.hbm %s3701_s8, 128 }
 0x8f1   :  { %p2691_p1 = scmp.ne.s32.totalorder %s3701_s8, %s2690_s10  ;;  %p2694_p2 = scmp.lt.u32.totalorder %s2690_s10, %s3701_s8 }
 0x8f3   :  { %p2696_p3 = pnand %p2694_p2, %p2691_p1 }
 0x8f5   :  { %2699 = shalt.err (!%p2696_p3)
}
 0x8f6   :  { %2040 = dma.vmem_to_hbm [thread:$0]  %s2038_s28, 128, %s3701_s8, [#allocation12]  }
 0x8f7   :  { %s2739_s15 = smov [#allocation10]  }
 0x8f8   :  { %s2014_s1 = sshll.u32 %s2739_s15, 4  ;;  %s2015_s1 = int_to_ptr.vmem [resolvable:$true] %s2014_s1 }
 0x8f9   :  { %s2700_s16 = scalar_lea.vmem %s2015_s1, 1024  ;;  %p2705_p5 = scmp.lt.s32.totalorder %s2015_s1, %s2015_s1 }
 0x8fa   :  { %p2701_p4 = scmp.ne.s32.totalorder %s2015_s1, %s2700_s16  ;;  %p2706_p6 = scmp.lt.s32.totalorder %s2700_s16, %s2700_s16 }
 0x8fc   :  { %p2707_p7 = por %p2706_p6, %p2705_p5 }
 0x8fe   :  { %p2708_p8 = pnand %p2707_p7, %p2701_p4 }
 0x95e   :  { %v1979_v54 = vpop.xlane.xlu1 %1978 }
 0x95f   :  { %2570 = vlog2.f32 %v1979_v54 }
 0x969   :  { %v2571_v30 = vpop.eup %2570 }
 0x96a   :  { %v1981_v55 = vmul.f32 0.6931472, %v2571_v30 }
 0x96c   :  { %v1982_v56 = vsub.f32 %v3653_v23, %v1981_v55 }
 0x96e   :  { %1983 = vst [vmem:[#allocation10 + $0x38] sm:$0xff] %v1982_v56 }
 0x96f   :  { %2711 = shalt.err (!%p2708_p8)
}
 0x970   :  { %s2712_s8 = scalar_lea.hbm %s3699_s6, 1024 }
 0x971   :  { %p2713_p9 = scmp.ne.s32.totalorder %s3699_s6, %s2712_s8  ;;  %p2716_p10 = scmp.lt.u32.totalorder %s2712_s8, %s3699_s6 }
 0x973   :  { %p2718_p11 = pnand %p2716_p10, %p2713_p9 }
 0x975   :  { %2721 = shalt.err (!%p2718_p11)
}
 0x976   :  { %s2740_s21 = smov 128   ;;  %s2741_s22 = smov 8  }
 0x977   :  { %2020 = dma.vmem_to_hbm [thread:$0]  %s2015_s1, 1024, %s3699_s6, [#allocation7], %s2740_s21, %s2740_s21, %s2741_s22  }
 0x978   :  { %2726 = dma.done.wait [#allocation7], 1024  }
 0x979   :  { %2727 = vsyncadd [#allocation7], 4294966272 }
 0x97a   :  { %2728 = dma.done.wait [#allocation12], 256  }
 0x97b   :  { %2729 = vsyncadd [#allocation12], 4294967040 }
 0x97c   :  { %2050 = vsyncpa [#allocation6], 1 }
 0x97d   :  { %2051 = vsyncpa [#allocation9], 1 }
 0x97e   :  { %2052 = vsyncpa [#allocation7], 1 }
 0x97f   :  { %2053 = vsyncpa [#allocation12], 1 }

</bundles_post_ra>
